<compile_context>
chip_gen: v7x
topology: tpu7x:2x2x1
jax: 0.10.0
libtpu: 0.0.40
codegen_flags: <defaults>
</compile_context>

<pallas_src>
import functools

import jax
import jax.numpy as jnp
from jax.experimental import pallas as pl
from jax.experimental.pallas import tpu as pltpu

LN_EPS = 1e-5  # torch.nn.LayerNorm default


def _layernorm(x, gamma, beta):
    # x: (M, D); gamma/beta: (1, D). Biased variance, matching torch.nn.LayerNorm.
    mean = jnp.mean(x, axis=-1, keepdims=True)
    var = jnp.mean((x - mean) ** 2, axis=-1, keepdims=True)
    return (x - mean) * jax.lax.rsqrt(var + LN_EPS) * gamma + beta


def _gelu_exact(x):
    # Matches torch.nn.GELU() default (erf-based, non-approximate).
    return 0.5 * x * (1.0 + jax.lax.erf(x * 0.7071067811865476))


def transformer_layer_kernel(x_ref, ln1_g_ref, ln1_b_ref,
                             wqkv_ref, wo_ref, bo_ref,
                             ln2_g_ref, ln2_b_ref, w1_ref, b1_ref, w2_ref, b2_ref,
                             y_ref, oflat_sc, *, heads, dim_head, scale):
    layer = pl.program_id(1)
    bf16 = jnp.bfloat16

    # Initialize the VMEM-resident carried activation from the input on layer 0
    # (also re-initializes whenever the batch block changes, since layer wraps to 0).
    @pl.when(layer == 0)
    def _():
        y_ref[...] = x_ref[...]

    BB, N, D = y_ref.shape
    M = BB * N
    H, dh = heads, dim_head
    inner = H * dh

    x = y_ref[...].reshape(M, D)                     # carried activation, f32

    # ---------------- PreNorm multi-head attention + residual ----------------
    n1 = _layernorm(x, ln1_g_ref[0], ln1_b_ref[0])   # (M, D) f32
    # Fused QKV: one large lane-dense matmul (f32 MXU accumulation), then bf16.
    qkv = jnp.dot(n1.astype(bf16), wqkv_ref[0],
                  preferred_element_type=jnp.float32).astype(bf16)   # (M, 3*H*dh)

    def split_heads(base):
        # Static lane slices + leading-dim reshapes + major-axis concat only
        # (all known-good Mosaic lowerings).  Result: (H*BB, N, dh), head-major.
        parts = [qkv[:, base + h * dh: base + (h + 1) * dh].reshape(BB, N, dh)
                 for h in range(H)]
        return parts[0] if H == 1 else jnp.concatenate(parts, axis=0)

    q = split_heads(0) * scale        # fold softmax scale into q (G*N*dh elems)
    k = split_heads(inner)
    v = split_heads(2 * inner)

    # Per-head scores: single leading-batch-dim batched matmuls (no transposes).
    s = jnp.einsum('gme,gne->gmn', q, k, preferred_element_type=jnp.float32)
    s = s - jnp.max(s, axis=-1, keepdims=True)
    p = jnp.exp(s)
    p = p * pl.reciprocal(jnp.sum(p, axis=-1, keepdims=True), approx=True)   # softmax
    o = jnp.einsum('gmn,gne->gme', p.astype(bf16), v,
                   preferred_element_type=jnp.float32).astype(bf16)          # (H*BB, N, dh)

    # Head-concat via cheap lane-slice stores into a small bf16 scratch, then ONE
    # big output-projection matmul (K = H*dh) -- no per-head projections, no
    # (heads, M, D) intermediate, no cross-head reduction.
    for h in range(H):
        oflat_sc[:, h * dh:(h + 1) * dh] = o[h * BB:(h + 1) * BB].reshape(M, dh)
    proj = jnp.dot(oflat_sc[...], wo_ref[0], preferred_element_type=jnp.float32)
    x = x + proj + bo_ref[0]                         # residual (+ to_out bias)

    # ---------------- PreNorm MLP + residual ----------------
    n2 = _layernorm(x, ln2_g_ref[0], ln2_b_ref[0])
    h1 = jnp.dot(n2.astype(bf16), w1_ref[0],
                 preferred_element_type=jnp.float32) + b1_ref[0]
    h1 = _gelu_exact(h1)                             # f32 (v5e has no bf16 VPU/EUP)
    y = jnp.dot(h1.astype(bf16), w2_ref[0],
                preferred_element_type=jnp.float32) + b2_ref[0]
    x = x + y                                        # residual

    y_ref[...] = x.reshape(BB, N, D)


def _pick_vmem_limit():
    # Chip-aware scoped-VMEM budget: above the 16/32 MiB default, below the
    # physical ceiling minus headroom (v7x: 64 MiB/TC; v5e/v6e: 128 MiB).
    try:
        cap = int(pltpu.get_tpu_info().vmem_capacity_bytes)
    except Exception:
        cap = 64 << 20
    return int(max(32 << 20, min(cap - (8 << 20), 112 << 20)))


def make_transformer_call(B, N, D, heads, dim_head, mlp_dim, depth, batch_block):
    assert B % batch_block == 0
    BB = batch_block
    inner = heads * dim_head
    kernel = functools.partial(transformer_layer_kernel, heads=heads,
                               dim_head=dim_head, scale=dim_head ** -0.5)
    x_map = lambda b, l: (b, 0, 0)        # per-batch-block, resident across depth
    lyr = lambda b, l: (l, 0, 0)          # per-layer weights (prefetched over l)
    return pl.pallas_call(
        kernel,
        out_shape=jax.ShapeDtypeStruct((B, N, D), jnp.float32),
        grid_spec=pltpu.PrefetchScalarGridSpec(
            num_scalar_prefetch=0,
            grid=(B // BB, depth),
            in_specs=[
                pl.BlockSpec((BB, N, D), x_map),                 # x
                pl.BlockSpec((1, 1, D), lyr),                    # ln1 gamma
                pl.BlockSpec((1, 1, D), lyr),                    # ln1 beta
                pl.BlockSpec((1, D, 3 * inner), lyr),            # fused Wqkv
                pl.BlockSpec((1, inner, D), lyr),                # Wo (concat-heads in, D out)
                pl.BlockSpec((1, 1, D), lyr),                    # bo
                pl.BlockSpec((1, 1, D), lyr),                    # ln2 gamma
                pl.BlockSpec((1, 1, D), lyr),                    # ln2 beta
                pl.BlockSpec((1, D, mlp_dim), lyr),              # W1
                pl.BlockSpec((1, 1, mlp_dim), lyr),              # b1
                pl.BlockSpec((1, mlp_dim, D), lyr),              # W2
                pl.BlockSpec((1, 1, D), lyr),                    # b2
            ],
            out_specs=pl.BlockSpec((BB, N, D), x_map),
            scratch_shapes=[pltpu.VMEM((BB * N, inner), jnp.bfloat16)],  # head-concat buffer
        ),
        compiler_params=pltpu.CompilerParams(
            dimension_semantics=("parallel", "arbitrary"),
            vmem_limit_bytes=_pick_vmem_limit()),
    )


def init_transformer_params(key, dim, depth, heads, dim_head, mlp_dim):
    inner = heads * dim_head
    k1, k2, k3, k4, k5, k6, k7 = jax.random.split(key, 7)
    std = 0.02
    f32 = jnp.float32
    return dict(
        ln1_g=jnp.ones((depth, 1, dim), f32),
        ln1_b=jnp.zeros((depth, 1, dim), f32),
        # to_qkv weight stored as W^T = (dim, 3*inner); columns ordered [q|k|v],
        # within each chunk head-major (h, d) -- matches torch chunk + rearrange.
        wqkv=std * jax.random.normal(k1, (depth, dim, 3 * inner), f32),
        wo=std * jax.random.normal(k2, (depth, inner, dim), f32),
        bo=std * jax.random.normal(k3, (depth, 1, dim), f32),
        ln2_g=jnp.ones((depth, 1, dim), f32),
        ln2_b=jnp.zeros((depth, 1, dim), f32),
        w1=std * jax.random.normal(k4, (depth, dim, mlp_dim), f32),
        b1=std * jax.random.normal(k5, (depth, 1, mlp_dim), f32),
        w2=std * jax.random.normal(k6, (depth, mlp_dim, dim), f32),
        b2=std * jax.random.normal(k7, (depth, 1, dim), f32),
    )


def transformer_forward(x, params, heads, dim_head, mlp_dim, batch_block=None):
    B, N, D = x.shape
    depth = params["w1"].shape[0]
    BB = B if batch_block is None else batch_block
    call = make_transformer_call(B, N, D, heads, dim_head, mlp_dim, depth, BB)
    bf16 = jnp.bfloat16   # bf16 weights: halves weight DMA, bf16 MXU path (f32 accum)
    return call(
        x,
        params["ln1_g"], params["ln1_b"],
        params["wqkv"].astype(bf16), params["wo"].astype(bf16), params["bo"],
        params["ln2_g"], params["ln2_b"],
        params["w1"].astype(bf16), params["b1"],
        params["w2"].astype(bf16), params["b2"],
    )


def transformer_reference(x, params, heads, dim_head):
    # Pure-JAX f32 reference mirroring the PyTorch forward.
    def ln(v, g, b):
        m = jnp.mean(v, -1, keepdims=True)
        var = jnp.mean((v - m) ** 2, -1, keepdims=True)
        return (v - m) / jnp.sqrt(var + LN_EPS) * g + b

    B, N, D = x.shape
    inner = heads * dim_head
    depth = params["w1"].shape[0]
    scale = dim_head ** -0.5
    for l in range(depth):
        n = ln(x, params["ln1_g"][l], params["ln1_b"][l])
        qkv = n @ params["wqkv"][l]                               # (B, N, 3*inner)
        q, k, v = jnp.split(qkv, 3, axis=-1)
        sh = lambda t: t.reshape(B, N, heads, dim_head).transpose(0, 2, 1, 3)
        q, k, v = sh(q), sh(k), sh(v)
        dots = jnp.einsum('bhnd,bhmd->bhnm', q, k) * scale
        attn = jax.nn.softmax(dots, axis=-1)
        out = jnp.einsum('bhnm,bhmd->bhnd', attn, v)
        out = out.transpose(0, 2, 1, 3).reshape(B, N, inner)      # b n (h d)
        x = out @ params["wo"][l] + params["bo"][l] + x
        n2 = ln(x, params["ln2_g"][l], params["ln2_b"][l])
        hid = _gelu_exact(n2 @ params["w1"][l] + params["b1"][l])
        x = hid @ params["w2"][l] + params["b2"][l] + x
    return x


if __name__ == "__main__":
    B, N, D = 2, 8, 32
    heads, dim_head, mlp_dim, depth = 4, 8, 64, 2

    key = jax.random.PRNGKey(0)
    key, kx = jax.random.split(key)
    x = jax.random.normal(kx, (B, N, D), jnp.float32)
    params = init_transformer_params(key, D, depth, heads, dim_head, mlp_dim)

    # batch_block=1 exercises both grid axes (per-batch-block carry re-init + depth sweep).
    out = transformer_forward(x, params, heads, dim_head, mlp_dim, batch_block=1)
    out = jax.block_until_ready(out)

    ref = transformer_reference(x, params, heads, dim_head)
    assert out.shape == (B, N, D)
    max_err = float(jnp.max(jnp.abs(out - ref)))
    # bf16 MXU inputs + approx reciprocal -> relaxed (but still tight) tolerance.
    assert jnp.allclose(out, ref, atol=3e-3, rtol=3e-3), f"mismatch vs reference: {max_err}"

    print("KERNEL_OK")
</pallas_src>

<mosaic_0001>
module attributes {stable_mosaic.version = 11 : i64} {
  func.func @transformer_layer_kernel(%arg0: i32, %arg1: i32, %arg2: memref<1x8x32xf32, #tpu.memory_space<vmem>>, %arg3: memref<1x1x32xf32, #tpu.memory_space<vmem>>, %arg4: memref<1x1x32xf32, #tpu.memory_space<vmem>>, %arg5: memref<1x32x96xbf16, #tpu.memory_space<vmem>>, %arg6: memref<1x32x32xbf16, #tpu.memory_space<vmem>>, %arg7: memref<1x1x32xf32, #tpu.memory_space<vmem>>, %arg8: memref<1x1x32xf32, #tpu.memory_space<vmem>>, %arg9: memref<1x1x32xf32, #tpu.memory_space<vmem>>, %arg10: memref<1x32x64xbf16, #tpu.memory_space<vmem>>, %arg11: memref<1x1x64xf32, #tpu.memory_space<vmem>>, %arg12: memref<1x64x32xbf16, #tpu.memory_space<vmem>>, %arg13: memref<1x1x32xf32, #tpu.memory_space<vmem>>, %arg14: memref<1x8x32xf32, #tpu.memory_space<vmem>>, %arg15: memref<8x32xbf16, #tpu.memory_space<vmem>>) attributes {dimension_semantics = [#tpu.dimension_semantics<parallel>, #tpu.dimension_semantics<arbitrary>], iteration_bounds = array<i64: 2, 2>, scalar_prefetch = 0 : i64, scratch_operands = 1 : i64, tpu.core_type = #tpu.core_type<tc>, window_params = [{transform_indices = @transform_0, window_bounds = array<i64: 1, 8, 32>}, {transform_indices = @transform_1, window_bounds = array<i64: 1, 1, 32>}, {transform_indices = @transform_2, window_bounds = array<i64: 1, 1, 32>}, {transform_indices = @transform_3, window_bounds = array<i64: 1, 32, 96>}, {transform_indices = @transform_4, window_bounds = array<i64: 1, 32, 32>}, {transform_indices = @transform_5, window_bounds = array<i64: 1, 1, 32>}, {transform_indices = @transform_6, window_bounds = array<i64: 1, 1, 32>}, {transform_indices = @transform_7, window_bounds = array<i64: 1, 1, 32>}, {transform_indices = @transform_8, window_bounds = array<i64: 1, 32, 64>}, {transform_indices = @transform_9, window_bounds = array<i64: 1, 1, 64>}, {transform_indices = @transform_10, window_bounds = array<i64: 1, 64, 32>}, {transform_indices = @transform_11, window_bounds = array<i64: 1, 1, 32>}, {transform_indices = @transform_12, window_bounds = array<i64: 1, 8, 32>}]} {
    %c0_i32 = arith.constant 0 : i32
    %0 = arith.cmpi eq, %arg1, %c0_i32 : i32
    %1 = arith.extui %0 : i1 to i32
    %c0_i32_0 = arith.constant 0 : i32
    %2 = arith.cmpi ne, %1, %c0_i32_0 : i32
    scf.if %2 {
      %c0_67 = arith.constant 0 : index
      %c0_68 = arith.constant 0 : index
      %c0_69 = arith.constant 0 : index
      %153 = vector.load %arg2[%c0_67, %c0_68, %c0_69] : memref<1x8x32xf32, #tpu.memory_space<vmem>>, vector<1x8x32xf32>
      %c0_70 = arith.constant 0 : index
      %c0_71 = arith.constant 0 : index
      %c0_72 = arith.constant 0 : index
      %154 = vector.load %arg14[%c0_70, %c0_71, %c0_72] : memref<1x8x32xf32, #tpu.memory_space<vmem>>, vector<1x8x32xf32>
      tpu.vector_store %arg14[%c0_70, %c0_71, %c0_72], %153 {strides = array<i32>} : memref<1x8x32xf32, #tpu.memory_space<vmem>>, vector<1x8x32xf32>,
    } else {
    }
    %c0 = arith.constant 0 : index
    %c0_1 = arith.constant 0 : index
    %c0_2 = arith.constant 0 : index
    %3 = vector.load %arg14[%c0, %c0_1, %c0_2] : memref<1x8x32xf32, #tpu.memory_space<vmem>>, vector<1x8x32xf32>
    %4 = vector.shape_cast %3 : vector<1x8x32xf32> to vector<8x32xf32>
    %c0_3 = arith.constant 0 : index
    %c0_4 = arith.constant 0 : index
    %c0_5 = arith.constant 0 : index
    %5 = vector.load %arg3[%c0_3, %c0_4, %c0_5] : memref<1x1x32xf32, #tpu.memory_space<vmem>>, vector<1x1x32xf32>
    %6 = vector.shape_cast %5 : vector<1x1x32xf32> to vector<1x32xf32>
    %c0_6 = arith.constant 0 : index
    %c0_7 = arith.constant 0 : index
    %c0_8 = arith.constant 0 : index
    %7 = vector.load %arg4[%c0_6, %c0_7, %c0_8] : memref<1x1x32xf32, #tpu.memory_space<vmem>>, vector<1x1x32xf32>
    %8 = vector.shape_cast %7 : vector<1x1x32xf32> to vector<1x32xf32>
    %cst = arith.constant dense<0.000000e+00> : vector<8xf32>
    %9 = vector.multi_reduction <add>, %4, %cst [1] : vector<8x32xf32> to vector<8xf32>
    %10 = vector.shape_cast %9 : vector<8xf32> to vector<8x1xf32>
    %cst_9 = arith.constant 3.200000e+01 : f32
    %11 = vector.broadcast %cst_9 : f32 to vector<8x1xf32>
    %12 = arith.divf %10, %11 : vector<8x1xf32>
    %13 = vector.broadcast %12 : vector<8x1xf32> to vector<8x32xf32>
    %14 = arith.subf %4, %13 : vector<8x32xf32>
    %15 = arith.mulf %14, %14 : vector<8x32xf32>
    %cst_10 = arith.constant dense<0.000000e+00> : vector<8xf32>
    %16 = vector.multi_reduction <add>, %15, %cst_10 [1] : vector<8x32xf32> to vector<8xf32>
    %17 = vector.shape_cast %16 : vector<8xf32> to vector<8x1xf32>
    %cst_11 = arith.constant 3.200000e+01 : f32
    %18 = vector.broadcast %cst_11 : f32 to vector<8x1xf32>
    %19 = arith.divf %17, %18 : vector<8x1xf32>
    %20 = vector.broadcast %12 : vector<8x1xf32> to vector<8x32xf32>
    %21 = arith.subf %4, %20 : vector<8x32xf32>
    %cst_12 = arith.constant 9.99999974E-6 : f32
    %22 = vector.broadcast %cst_12 : f32 to vector<8x1xf32>
    %23 = arith.addf %19, %22 : vector<8x1xf32>
    %24 = math.rsqrt %23 : vector<8x1xf32>
    %25 = vector.broadcast %24 : vector<8x1xf32> to vector<8x32xf32>
    %26 = arith.mulf %21, %25 : vector<8x32xf32>
    %27 = vector.broadcast %6 : vector<1x32xf32> to vector<8x32xf32>
    %28 = arith.mulf %26, %27 : vector<8x32xf32>
    %29 = vector.broadcast %8 : vector<1x32xf32> to vector<8x32xf32>
    %30 = arith.addf %28, %29 : vector<8x32xf32>
    %31 = arith.truncf %30 : vector<8x32xf32> to vector<8x32xbf16>
    %c0_13 = arith.constant 0 : index
    %c0_14 = arith.constant 0 : index
    %c0_15 = arith.constant 0 : index
    %32 = vector.load %arg5[%c0_13, %c0_14, %c0_15] : memref<1x32x96xbf16, #tpu.memory_space<vmem>>, vector<1x32x96xbf16>
    %33 = vector.shape_cast %32 : vector<1x32x96xbf16> to vector<32x96xbf16>
    %cst_16 = arith.constant dense<0.000000e+00> : vector<8x96xf32>
    %34 = tpu.matmul %31, %33, %cst_16 {dimension_numbers = #tpu.dot_dimension_numbers<[1], [0], [0], [1], [0, 0, 1, 1], [], []>} : vector<8x32xbf16>, vector<32x96xbf16>, vector<8x96xf32> -> vector<8x96xf32>
    %35 = arith.truncf %34 : vector<8x96xf32> to vector<8x96xbf16>
    %36 = vector.extract_strided_slice %35 {offsets = [0, 0], sizes = [8, 8], strides = [1, 1]} : vector<8x96xbf16> to vector<8x8xbf16>
    %37 = vector.shape_cast %36 : vector<8x8xbf16> to vector<1x8x8xbf16>
    %38 = vector.extract_strided_slice %35 {offsets = [0, 8], sizes = [8, 8], strides = [1, 1]} : vector<8x96xbf16> to vector<8x8xbf16>
    %39 = vector.shape_cast %38 : vector<8x8xbf16> to vector<1x8x8xbf16>
    %40 = vector.extract_strided_slice %35 {offsets = [0, 16], sizes = [8, 8], strides = [1, 1]} : vector<8x96xbf16> to vector<8x8xbf16>
    %41 = vector.shape_cast %40 : vector<8x8xbf16> to vector<1x8x8xbf16>
    %42 = vector.extract_strided_slice %35 {offsets = [0, 24], sizes = [8, 8], strides = [1, 1]} : vector<8x96xbf16> to vector<8x8xbf16>
    %43 = vector.shape_cast %42 : vector<8x8xbf16> to vector<1x8x8xbf16>
    %44 = tpu.concatenate %37, %39, %41, %43 in 0 : vector<1x8x8xbf16>, vector<1x8x8xbf16>, vector<1x8x8xbf16>, vector<1x8x8xbf16> -> vector<4x8x8xbf16>
    %cst_17 = arith.constant 3.535160e-01 : bf16
    %45 = vector.broadcast %cst_17 : bf16 to vector<4x8x8xbf16>
    %46 = arith.mulf %44, %45 : vector<4x8x8xbf16>
    %47 = vector.extract_strided_slice %35 {offsets = [0, 32], sizes = [8, 8], strides = [1, 1]} : vector<8x96xbf16> to vector<8x8xbf16>
    %48 = vector.shape_cast %47 : vector<8x8xbf16> to vector<1x8x8xbf16>
    %49 = vector.extract_strided_slice %35 {offsets = [0, 40], sizes = [8, 8], strides = [1, 1]} : vector<8x96xbf16> to vector<8x8xbf16>
    %50 = vector.shape_cast %49 : vector<8x8xbf16> to vector<1x8x8xbf16>
    %51 = vector.extract_strided_slice %35 {offsets = [0, 48], sizes = [8, 8], strides = [1, 1]} : vector<8x96xbf16> to vector<8x8xbf16>
    %52 = vector.shape_cast %51 : vector<8x8xbf16> to vector<1x8x8xbf16>
    %53 = vector.extract_strided_slice %35 {offsets = [0, 56], sizes = [8, 8], strides = [1, 1]} : vector<8x96xbf16> to vector<8x8xbf16>
    %54 = vector.shape_cast %53 : vector<8x8xbf16> to vector<1x8x8xbf16>
    %55 = tpu.concatenate %48, %50, %52, %54 in 0 : vector<1x8x8xbf16>, vector<1x8x8xbf16>, vector<1x8x8xbf16>, vector<1x8x8xbf16> -> vector<4x8x8xbf16>
    %56 = vector.extract_strided_slice %35 {offsets = [0, 64], sizes = [8, 8], strides = [1, 1]} : vector<8x96xbf16> to vector<8x8xbf16>
    %57 = vector.shape_cast %56 : vector<8x8xbf16> to vector<1x8x8xbf16>
    %58 = vector.extract_strided_slice %35 {offsets = [0, 72], sizes = [8, 8], strides = [1, 1]} : vector<8x96xbf16> to vector<8x8xbf16>
    %59 = vector.shape_cast %58 : vector<8x8xbf16> to vector<1x8x8xbf16>
    %60 = vector.extract_strided_slice %35 {offsets = [0, 80], sizes = [8, 8], strides = [1, 1]} : vector<8x96xbf16> to vector<8x8xbf16>
    %61 = vector.shape_cast %60 : vector<8x8xbf16> to vector<1x8x8xbf16>
    %62 = vector.extract_strided_slice %35 {offsets = [0, 88], sizes = [8, 8], strides = [1, 1]} : vector<8x96xbf16> to vector<8x8xbf16>
    %63 = vector.shape_cast %62 : vector<8x8xbf16> to vector<1x8x8xbf16>
    %64 = tpu.concatenate %57, %59, %61, %63 in 0 : vector<1x8x8xbf16>, vector<1x8x8xbf16>, vector<1x8x8xbf16>, vector<1x8x8xbf16> -> vector<4x8x8xbf16>
    "tpu.trace_start"() <{level = 10 : i32, message = "gme,gne->gmn"}> : () -> ()
    %cst_18 = arith.constant dense<0.000000e+00> : vector<4x8x8xf32>
    %65 = tpu.matmul %46, %55, %cst_18 {dimension_numbers = #tpu.dot_dimension_numbers<[2], [2], [1], [1], [0, 0, 0, 1, 1, 1], [0], [0]>} : vector<4x8x8xbf16>, vector<4x8x8xbf16>, vector<4x8x8xf32> -> vector<4x8x8xf32>
    "tpu.trace_stop"() : () -> ()
    %cst_19 = arith.constant dense<0xFF800000> : vector<4x8xf32>
    %66 = vector.multi_reduction <maximumf>, %65, %cst_19 [2] : vector<4x8x8xf32> to vector<4x8xf32>
    %67 = vector.shape_cast %66 : vector<4x8xf32> to vector<4x8x1xf32>
    %68 = vector.broadcast %67 : vector<4x8x1xf32> to vector<4x8x8xf32>
    %69 = arith.subf %65, %68 : vector<4x8x8xf32>
    %70 = math.exp %69 : vector<4x8x8xf32>
    %cst_20 = arith.constant dense<0.000000e+00> : vector<4x8xf32>
    %71 = vector.multi_reduction <add>, %70, %cst_20 [2] : vector<4x8x8xf32> to vector<4x8xf32>
    %72 = vector.shape_cast %71 : vector<4x8xf32> to vector<4x8x1xf32>
    %73 = tpu.reciprocal %72 {approx = true} : vector<4x8x1xf32> -> vector<4x8x1xf32>
    %74 = vector.broadcast %73 : vector<4x8x1xf32> to vector<4x8x8xf32>
    %75 = arith.mulf %70, %74 : vector<4x8x8xf32>
    %76 = arith.truncf %75 : vector<4x8x8xf32> to vector<4x8x8xbf16>
    "tpu.trace_start"() <{level = 10 : i32, message = "gmn,gne->gme"}> : () -> ()
    %cst_21 = arith.constant dense<0.000000e+00> : vector<4x8x8xf32>
    %77 = tpu.matmul %76, %64, %cst_21 {dimension_numbers = #tpu.dot_dimension_numbers<[2], [1], [1], [2], [0, 0, 0, 1, 1, 2], [0], [0]>} : vector<4x8x8xbf16>, vector<4x8x8xbf16>, vector<4x8x8xf32> -> vector<4x8x8xf32>
    "tpu.trace_stop"() : () -> ()
    %78 = arith.truncf %77 : vector<4x8x8xf32> to vector<4x8x8xbf16>
    %79 = vector.extract_strided_slice %78 {offsets = [0, 0, 0], sizes = [1, 8, 8], strides = [1, 1, 1]} : vector<4x8x8xbf16> to vector<1x8x8xbf16>
    %80 = vector.shape_cast %79 : vector<1x8x8xbf16> to vector<8x8xbf16>
    %c0_22 = arith.constant 0 : index
    %c0_23 = arith.constant 0 : index
    %81 = vector.load %arg15[%c0_22, %c0_23] : memref<8x32xbf16, #tpu.memory_space<vmem>>, vector<8x8xbf16>
    tpu.vector_store %arg15[%c0_22, %c0_23], %80 {strides = array<i32>} : memref<8x32xbf16, #tpu.memory_space<vmem>>, vector<8x8xbf16>,
    %82 = vector.extract_strided_slice %78 {offsets = [1, 0, 0], sizes = [1, 8, 8], strides = [1, 1, 1]} : vector<4x8x8xbf16> to vector<1x8x8xbf16>
    %83 = vector.shape_cast %82 : vector<1x8x8xbf16> to vector<8x8xbf16>
    %c0_24 = arith.constant 0 : index
    %c8 = arith.constant 8 : index
    %84 = vector.load %arg15[%c0_24, %c8] : memref<8x32xbf16, #tpu.memory_space<vmem>>, vector<8x8xbf16>
    tpu.vector_store %arg15[%c0_24, %c8], %83 {strides = array<i32>} : memref<8x32xbf16, #tpu.memory_space<vmem>>, vector<8x8xbf16>,
    %85 = vector.extract_strided_slice %78 {offsets = [2, 0, 0], sizes = [1, 8, 8], strides = [1, 1, 1]} : vector<4x8x8xbf16> to vector<1x8x8xbf16>
    %86 = vector.shape_cast %85 : vector<1x8x8xbf16> to vector<8x8xbf16>
    %c0_25 = arith.constant 0 : index
    %c16 = arith.constant 16 : index
    %87 = vector.load %arg15[%c0_25, %c16] : memref<8x32xbf16, #tpu.memory_space<vmem>>, vector<8x8xbf16>
    tpu.vector_store %arg15[%c0_25, %c16], %86 {strides = array<i32>} : memref<8x32xbf16, #tpu.memory_space<vmem>>, vector<8x8xbf16>,
    %88 = vector.extract_strided_slice %78 {offsets = [3, 0, 0], sizes = [1, 8, 8], strides = [1, 1, 1]} : vector<4x8x8xbf16> to vector<1x8x8xbf16>
    %89 = vector.shape_cast %88 : vector<1x8x8xbf16> to vector<8x8xbf16>
    %c0_26 = arith.constant 0 : index
    %c24 = arith.constant 24 : index
    %90 = vector.load %arg15[%c0_26, %c24] : memref<8x32xbf16, #tpu.memory_space<vmem>>, vector<8x8xbf16>
    tpu.vector_store %arg15[%c0_26, %c24], %89 {strides = array<i32>} : memref<8x32xbf16, #tpu.memory_space<vmem>>, vector<8x8xbf16>,
    %c0_27 = arith.constant 0 : index
    %c0_28 = arith.constant 0 : index
    %91 = vector.load %arg15[%c0_27, %c0_28] : memref<8x32xbf16, #tpu.memory_space<vmem>>, vector<8x32xbf16>
    %c0_29 = arith.constant 0 : index
    %c0_30 = arith.constant 0 : index
    %c0_31 = arith.constant 0 : index
    %92 = vector.load %arg6[%c0_29, %c0_30, %c0_31] : memref<1x32x32xbf16, #tpu.memory_space<vmem>>, vector<1x32x32xbf16>
    %93 = vector.shape_cast %92 : vector<1x32x32xbf16> to vector<32x32xbf16>
    %cst_32 = arith.constant dense<0.000000e+00> : vector<8x32xf32>
    %94 = tpu.matmul %91, %93, %cst_32 {dimension_numbers = #tpu.dot_dimension_numbers<[1], [0], [0], [1], [0, 0, 1, 1], [], []>} : vector<8x32xbf16>, vector<32x32xbf16>, vector<8x32xf32> -> vector<8x32xf32>
    %95 = arith.addf %4, %94 : vector<8x32xf32>
    %c0_33 = arith.constant 0 : index
    %c0_34 = arith.constant 0 : index
    %c0_35 = arith.constant 0 : index
    %96 = vector.load %arg7[%c0_33, %c0_34, %c0_35] : memref<1x1x32xf32, #tpu.memory_space<vmem>>, vector<1x1x32xf32>
    %97 = vector.shape_cast %96 : vector<1x1x32xf32> to vector<1x32xf32>
    %98 = vector.broadcast %97 : vector<1x32xf32> to vector<8x32xf32>
    %99 = arith.addf %95, %98 : vector<8x32xf32>
    %c0_36 = arith.constant 0 : index
    %c0_37 = arith.constant 0 : index
    %c0_38 = arith.constant 0 : index
    %100 = vector.load %arg8[%c0_36, %c0_37, %c0_38] : memref<1x1x32xf32, #tpu.memory_space<vmem>>, vector<1x1x32xf32>
    %101 = vector.shape_cast %100 : vector<1x1x32xf32> to vector<1x32xf32>
    %c0_39 = arith.constant 0 : index
    %c0_40 = arith.constant 0 : index
    %c0_41 = arith.constant 0 : index
    %102 = vector.load %arg9[%c0_39, %c0_40, %c0_41] : memref<1x1x32xf32, #tpu.memory_space<vmem>>, vector<1x1x32xf32>
    %103 = vector.shape_cast %102 : vector<1x1x32xf32> to vector<1x32xf32>
    %cst_42 = arith.constant dense<0.000000e+00> : vector<8xf32>
    %104 = vector.multi_reduction <add>, %99, %cst_42 [1] : vector<8x32xf32> to vector<8xf32>
    %105 = vector.shape_cast %104 : vector<8xf32> to vector<8x1xf32>
    %cst_43 = arith.constant 3.200000e+01 : f32
    %106 = vector.broadcast %cst_43 : f32 to vector<8x1xf32>
    %107 = arith.divf %105, %106 : vector<8x1xf32>
    %108 = vector.broadcast %107 : vector<8x1xf32> to vector<8x32xf32>
    %109 = arith.subf %99, %108 : vector<8x32xf32>
    %110 = arith.mulf %109, %109 : vector<8x32xf32>
    %cst_44 = arith.constant dense<0.000000e+00> : vector<8xf32>
    %111 = vector.multi_reduction <add>, %110, %cst_44 [1] : vector<8x32xf32> to vector<8xf32>
    %112 = vector.shape_cast %111 : vector<8xf32> to vector<8x1xf32>
    %cst_45 = arith.constant 3.200000e+01 : f32
    %113 = vector.broadcast %cst_45 : f32 to vector<8x1xf32>
    %114 = arith.divf %112, %113 : vector<8x1xf32>
    %115 = vector.broadcast %107 : vector<8x1xf32> to vector<8x32xf32>
    %116 = arith.subf %99, %115 : vector<8x32xf32>
    %cst_46 = arith.constant 9.99999974E-6 : f32
    %117 = vector.broadcast %cst_46 : f32 to vector<8x1xf32>
    %118 = arith.addf %114, %117 : vector<8x1xf32>
    %119 = math.rsqrt %118 : vector<8x1xf32>
    %120 = vector.broadcast %119 : vector<8x1xf32> to vector<8x32xf32>
    %121 = arith.mulf %116, %120 : vector<8x32xf32>
    %122 = vector.broadcast %101 : vector<1x32xf32> to vector<8x32xf32>
    %123 = arith.mulf %121, %122 : vector<8x32xf32>
    %124 = vector.broadcast %103 : vector<1x32xf32> to vector<8x32xf32>
    %125 = arith.addf %123, %124 : vector<8x32xf32>
    %126 = arith.truncf %125 : vector<8x32xf32> to vector<8x32xbf16>
    %c0_47 = arith.constant 0 : index
    %c0_48 = arith.constant 0 : index
    %c0_49 = arith.constant 0 : index
    %127 = vector.load %arg10[%c0_47, %c0_48, %c0_49] : memref<1x32x64xbf16, #tpu.memory_space<vmem>>, vector<1x32x64xbf16>
    %128 = vector.shape_cast %127 : vector<1x32x64xbf16> to vector<32x64xbf16>
    %cst_50 = arith.constant dense<0.000000e+00> : vector<8x64xf32>
    %129 = tpu.matmul %126, %128, %cst_50 {dimension_numbers = #tpu.dot_dimension_numbers<[1], [0], [0], [1], [0, 0, 1, 1], [], []>} : vector<8x32xbf16>, vector<32x64xbf16>, vector<8x64xf32> -> vector<8x64xf32>
    %c0_51 = arith.constant 0 : index
    %c0_52 = arith.constant 0 : index
    %c0_53 = arith.constant 0 : index
    %130 = vector.load %arg11[%c0_51, %c0_52, %c0_53] : memref<1x1x64xf32, #tpu.memory_space<vmem>>, vector<1x1x64xf32>
    %131 = vector.shape_cast %130 : vector<1x1x64xf32> to vector<1x64xf32>
    %132 = vector.broadcast %131 : vector<1x64xf32> to vector<8x64xf32>
    %133 = arith.addf %129, %132 : vector<8x64xf32>
    %cst_54 = arith.constant 5.000000e-01 : f32
    %134 = vector.broadcast %cst_54 : f32 to vector<8x64xf32>
    %135 = arith.mulf %134, %133 : vector<8x64xf32>
    %cst_55 = arith.constant 0.707106769 : f32
    %136 = vector.broadcast %cst_55 : f32 to vector<8x64xf32>
    %137 = arith.mulf %133, %136 : vector<8x64xf32>
    %138 = math.erf %137 : vector<8x64xf32>
    %cst_56 = arith.constant 1.000000e+00 : f32
    %139 = vector.broadcast %cst_56 : f32 to vector<8x64xf32>
    %140 = arith.addf %139, %138 : vector<8x64xf32>
    %141 = arith.mulf %135, %140 : vector<8x64xf32>
    %142 = arith.truncf %141 : vector<8x64xf32> to vector<8x64xbf16>
    %c0_57 = arith.constant 0 : index
    %c0_58 = arith.constant 0 : index
    %c0_59 = arith.constant 0 : index
    %143 = vector.load %arg12[%c0_57, %c0_58, %c0_59] : memref<1x64x32xbf16, #tpu.memory_space<vmem>>, vector<1x64x32xbf16>
    %144 = vector.shape_cast %143 : vector<1x64x32xbf16> to vector<64x32xbf16>
    %cst_60 = arith.constant dense<0.000000e+00> : vector<8x32xf32>
    %145 = tpu.matmul %142, %144, %cst_60 {dimension_numbers = #tpu.dot_dimension_numbers<[1], [0], [0], [1], [0, 0, 1, 1], [], []>} : vector<8x64xbf16>, vector<64x32xbf16>, vector<8x32xf32> -> vector<8x32xf32>
    %c0_61 = arith.constant 0 : index
    %c0_62 = arith.constant 0 : index
    %c0_63 = arith.constant 0 : index
    %146 = vector.load %arg13[%c0_61, %c0_62, %c0_63] : memref<1x1x32xf32, #tpu.memory_space<vmem>>, vector<1x1x32xf32>
    %147 = vector.shape_cast %146 : vector<1x1x32xf32> to vector<1x32xf32>
    %148 = vector.broadcast %147 : vector<1x32xf32> to vector<8x32xf32>
    %149 = arith.addf %145, %148 : vector<8x32xf32>
    %150 = arith.addf %99, %149 : vector<8x32xf32>
    %151 = vector.shape_cast %150 : vector<8x32xf32> to vector<1x8x32xf32>
    %c0_64 = arith.constant 0 : index
    %c0_65 = arith.constant 0 : index
    %c0_66 = arith.constant 0 : index
    %152 = vector.load %arg14[%c0_64, %c0_65, %c0_66] : memref<1x8x32xf32, #tpu.memory_space<vmem>>, vector<1x8x32xf32>
    tpu.vector_store %arg14[%c0_64, %c0_65, %c0_66], %151 {strides = array<i32>} : memref<1x8x32xf32, #tpu.memory_space<vmem>>, vector<1x8x32xf32>,
    return
  }
  func.func @transform_0(%arg0: i32, %arg1: i32) -> (i32, i32, i32) {
    %c0_i32 = arith.constant 0 : i32
    %c0_i32_0 = arith.constant 0 : i32
    %c0_i32_1 = arith.constant 0 : i32
    return %arg0, %c0_i32, %c0_i32_0 : i32, i32, i32
  }
  func.func @transform_1(%arg0: i32, %arg1: i32) -> (i32, i32, i32) {
    %c0_i32 = arith.constant 0 : i32
    %c0_i32_0 = arith.constant 0 : i32
    %c0_i32_1 = arith.constant 0 : i32
    return %arg1, %c0_i32, %c0_i32_0 : i32, i32, i32
  }
  func.func @transform_2(%arg0: i32, %arg1: i32) -> (i32, i32, i32) {
    %c0_i32 = arith.constant 0 : i32
    %c0_i32_0 = arith.constant 0 : i32
    %c0_i32_1 = arith.constant 0 : i32
    return %arg1, %c0_i32, %c0_i32_0 : i32, i32, i32
  }
  func.func @transform_3(%arg0: i32, %arg1: i32) -> (i32, i32, i32) {
    %c0_i32 = arith.constant 0 : i32
    %c0_i32_0 = arith.constant 0 : i32
    %c0_i32_1 = arith.constant 0 : i32
    return %arg1, %c0_i32, %c0_i32_0 : i32, i32, i32
  }
  func.func @transform_4(%arg0: i32, %arg1: i32) -> (i32, i32, i32) {
    %c0_i32 = arith.constant 0 : i32
    %c0_i32_0 = arith.constant 0 : i32
    %c0_i32_1 = arith.constant 0 : i32
    return %arg1, %c0_i32, %c0_i32_0 : i32, i32, i32
  }
  func.func @transform_5(%arg0: i32, %arg1: i32) -> (i32, i32, i32) {
    %c0_i32 = arith.constant 0 : i32
    %c0_i32_0 = arith.constant 0 : i32
    %c0_i32_1 = arith.constant 0 : i32
    return %arg1, %c0_i32, %c0_i32_0 : i32, i32, i32
  }
  func.func @transform_6(%arg0: i32, %arg1: i32) -> (i32, i32, i32) {
    %c0_i32 = arith.constant 0 : i32
    %c0_i32_0 = arith.constant 0 : i32
    %c0_i32_1 = arith.constant 0 : i32
    return %arg1, %c0_i32, %c0_i32_0 : i32, i32, i32
  }
  func.func @transform_7(%arg0: i32, %arg1: i32) -> (i32, i32, i32) {
    %c0_i32 = arith.constant 0 : i32
    %c0_i32_0 = arith.constant 0 : i32
    %c0_i32_1 = arith.constant 0 : i32
    return %arg1, %c0_i32, %c0_i32_0 : i32, i32, i32
  }
  func.func @transform_8(%arg0: i32, %arg1: i32) -> (i32, i32, i32) {
    %c0_i32 = arith.constant 0 : i32
    %c0_i32_0 = arith.constant 0 : i32
    %c0_i32_1 = arith.constant 0 : i32
    return %arg1, %c0_i32, %c0_i32_0 : i32, i32, i32
  }
  func.func @transform_9(%arg0: i32, %arg1: i32) -> (i32, i32, i32) {
    %c0_i32 = arith.constant 0 : i32
    %c0_i32_0 = arith.constant 0 : i32
    %c0_i32_1 = arith.constant 0 : i32
    return %arg1, %c0_i32, %c0_i32_0 : i32, i32, i32
  }
  func.func @transform_10(%arg0: i32, %arg1: i32) -> (i32, i32, i32) {
    %c0_i32 = arith.constant 0 : i32
    %c0_i32_0 = arith.constant 0 : i32
    %c0_i32_1 = arith.constant 0 : i32
    return %arg1, %c0_i32, %c0_i32_0 : i32, i32, i32
  }
  func.func @transform_11(%arg0: i32, %arg1: i32) -> (i32, i32, i32) {
    %c0_i32 = arith.constant 0 : i32
    %c0_i32_0 = arith.constant 0 : i32
    %c0_i32_1 = arith.constant 0 : i32
    return %arg1, %c0_i32, %c0_i32_0 : i32, i32, i32
  }
  func.func @transform_12(%arg0: i32, %arg1: i32) -> (i32, i32, i32) {
    %c0_i32 = arith.constant 0 : i32
    %c0_i32_0 = arith.constant 0 : i32
    %c0_i32_1 = arith.constant 0 : i32
    return %arg0, %c0_i32, %c0_i32_0 : i32, i32, i32
  }
}

</mosaic_0001>

<bundles_post_ra>
// kernel: tpu_custom_call.1
= control target key start
LH: loop header
LB: loop body
LE: loop exit
PB: predicated region body
PF: predicated region fallthrough
CT: control target
= control target key end

     0   :  { %s3069_s0 = inlined_call_operand.hbm [shape: f32[2,8,32], index: 0, kind: input, shape index: {}]   ;;  %s3070_s1 = inlined_call_operand.vmem [shape: f32[2,1,32], index: 1, kind: input, shape index: {}]   ;;  %s3071_s2 = inlined_call_operand.vmem [shape: f32[2,1,32], index: 2, kind: input, shape index: {}]   ;;  %s3072_s3 = inlined_call_operand.vmem [shape: bf16[2,32,96], index: 3, kind: input, shape index: {}]   ;;  %s3073_s4 = inlined_call_operand.vmem [shape: bf16[2,32,32], index: 4, kind: input, shape index: {}]   ;;  %s3074_s5 = inlined_call_operand.hbm [shape: f32[2,1,32], index: 5, kind: input, shape index: {}]   ;;  %s3075_s6 = inlined_call_operand.hbm [shape: f32[2,1,32], index: 6, kind: input, shape index: {}]   ;;  %s3076_s7 = inlined_call_operand.hbm [shape: f32[2,1,32], index: 7, kind: input, shape index: {}]   ;;  %s3077_s8 = inlined_call_operand.vmem [shape: bf16[2,32,64], index: 8, kind: input, shape index: {}]   ;;  %s3078_s9 = inlined_call_operand.hbm [shape: f32[2,1,64], index: 9, kind: input, shape index: {}]   ;;  %s3079_s10 = inlined_call_operand.vmem [shape: bf16[2,64,32], index: 10, kind: input, shape index: {}]   ;;  %s3080_s11 = inlined_call_operand.vmem [shape: f32[2,1,32], index: 11, kind: input, shape index: {}]   ;;  %s3081_s12 = inlined_call_operand.hbm [shape: f32[2,8,32], index: 12, kind: output, shape index: {}]  }
   0x1   :  { %3103 = sst [smem:[#allocation30_spill]] %s3069_s0 }
   0x2   :  { %3104 = sst [smem:[#allocation31_spill]] %s3070_s1 }
   0x3   :  { %3105 = sst [smem:[#allocation32_spill]] %s3071_s2 }
   0x4   :  { %3106 = sst [smem:[#allocation33_spill]] %s3072_s3 }
   0x5   :  { %3107 = sst [smem:[#allocation34_spill]] %s3073_s4 }
   0x6   :  { %3108 = sst [smem:[#allocation35_spill]] %s3074_s5 }
   0x7   :  { %3109 = sst [smem:[#allocation36_spill]] %s3075_s6 }
   0x8   :  { %3110 = sst [smem:[#allocation37_spill]] %s3076_s7 }
   0x9   :  { %3111 = sst [smem:[#allocation38_spill]] %s3077_s8 }
   0xa   :  { %3112 = sst [smem:[#allocation39_spill]] %s3078_s9 }
   0xb   :  { %3113 = sst [smem:[#allocation40_spill]] %s3079_s10 }
   0xc   :  { %3114 = sst [smem:[#allocation41_spill]] %s3080_s11 }
   0xd   :  { %3115 = sst [smem:[#allocation42_spill]] %s3081_s12 }
   0xe   :  { %17 = vsyncpa [#allocation4], 0 }
   0xf   :  { %19 = vsyncpa [#allocation4 + $0x1], 0 }
  0x10   :  { %20 = vsyncpa [#allocation7], 0 }
  0x11   :  { %22 = vsyncpa [#allocation7 + $0x1], 0 }
  0x12   :  { %23 = vsyncpa [#allocation10], 0 }
  0x13   :  { %25 = vsyncpa [#allocation10 + $0x1], 0 }
  0x14   :  { %26 = vsyncpa [#allocation5], 0 }
  0x15   :  { %28 = vsyncpa [#allocation5 + $0x1], 0  ;;  %s2479_s21 = smov 0   ;;  %s2481_s22 = smov 0  }
  0x16   :  { %s2483_s23 = smov 0   ;;  %s2485_s24 = smov 0  }
  0x17   :  { %s2487_s25 = smov 0   ;;  %s2489_s26 = smov 0  }
  0x18   :  { %s2491_s27 = smov 0   ;;  %s2493_s28 = smov 0  }
  0x19   :  { %s2495_s29 = smov 0   ;;  %s2497_s30 = smov 0  }
  0x1a   :  { %s2499_s13 = smov 0  }
  0x1b LB: > { %3116 = sst [smem:[#allocation17_spill]] %s2364_s23  ;;  %s43_s14 = sadd.s32 1, %s2388_s29  ;;  %s2396_s13 = sphi %s2499_s13, %s34_s13   ;;  %s2392_s30 = sphi %s2497_s30, %s3190_s30   ;;  %s2388_s29 = sphi %s2495_s29, %s3186_s29   ;;  %s2384_s28 = sphi %s2493_s28, %s3185_s28   ;;  %s2380_s27 = sphi %s2491_s27, %s3184_s27   ;;  %s2376_s26 = sphi %s2489_s26, %s3183_s26   ;;  %s2372_s25 = sphi %s2487_s25, %s3182_s25   ;;  %s2368_s24 = sphi %s2485_s24, %s3181_s24   ;;  %s2364_s23 = sphi %s2483_s23, %s3180_s23   ;;  %s2360_s22 = sphi %s2481_s22, %s3189_s22   ;;  %s2356_s21 = sphi %s2479_s21, %s3188_s21  }
  0x1c   : > { %3117 = sst [smem:[#allocation18_spill]] %s2372_s25  ;;  %p3087_p0 = scmp.eq.s32.totalorder %s2396_s13, 0 }
  0x1d   : > { %3118 = sst [smem:[#allocation19_spill]] %s2376_s26  ;;  %p2536_p1 = scmp.ge.s32.totalorder %s43_s14, 2 }
  0x1e   : > { %3119 = sst [smem:[#allocation20_spill]] %s2380_s27  ;;  %s183_s16 = sadd.s32 1, %s2364_s23 }
  0x1f   : > { %3120 = sst [smem:[#allocation21_spill]] %s2384_s28  ;;  %p190_p2 = scmp.ne.s32.totalorder %s2364_s23, %s2360_s22 }
  0x20   : > { %3121 = sst [smem:[#allocation22_spill]] %s2388_s29  ;;  %s3192_s14 = smov (%p2536_p1, %s43_s14), 0 }
  0x21   : > { %3122 = sst [smem:[#allocation23_spill]] %s2392_s30  ;;  %p192_p4 = por %p190_p2, %p3087_p0 }
  0x22   : > { %s3123_s15 = scalar_select %p2536_p1, 1, 0 }
  0x23   : > { %3124 = sst [smem:[#allocation24_spill]] %s3192_s14  ;;  %s180_s17 = ssub.s32 %s2388_s29, %s3192_s14 }
  0x24   : > { %p3086_p5 = scmp.lt.s32.totalorder %s2396_s13, 4  ;;  %p181_p6 = scmp.eq.s32.totalorder %s180_s17, 0 }
  0x25   : > { %s3088_s18 = sand.u32 1, %s2396_s13   ;;  %s2556_s19 = sand.u32 1, %s2364_s23  }
  0x26   : > { %s2559_s20 = scalar_select %p181_p6, %s2364_s23, %s183_s16  }
  0x27   : > { %s2562_s12 = sshll.u32 %s2388_s29, 4  ;;  %s3126_s5 = sld [smem:[#allocation35_spill]] }
  0x28   : > { %3125 = sst [smem:[#allocation25_spill]] %s2559_s20  ;;  %s451_s14 = scalar_lea.vmem [#allocation6], %s2556_s19 }
  0x29   : > { %s458_s17 = sshll.u32 %s451_s14, 4  ;;  %p2575_p7 = pnand %p3086_p5, %p192_p4  ;;  %s2571_s17 = int_to_ptr.vmem [resolvable:$true] %s458_s17 }
  0x2a   : > { %s2583_s11 = scalar_lea.sflag [#allocation7], %s3088_s18 }
  0x2b   : > { %s3127_s16 = scalar_select %p2575_p7, 1, 0 }
  0x2c   : > { %p2589_p11 = pneg %p2575_p7 }
  0x2d   : > { %s2568_s10 = scalar_lea.hbm %s3126_s5, %s2562_s12  ;;  %s2121_s23 = scalar_lea.hbm %s3126_s5, 32 }
  0x2e   : > { %s2116_s28 = scalar_lea.hbm %s2568_s10, 16  ;;  %p2122_p2 = scmp.lt.u32.totalorder %s2568_s10, %s3126_s5 }
  0x2f   : > { %p2117_p10 = scmp.ne.s32.totalorder %s2568_s10, %s2116_s28  ;;  %p2123_p4 = scmp.lt.u32.totalorder %s2121_s23, %s2116_s28 }
  0x30   : > { %p2125_p5 = scmp.lt.u32.totalorder %s2116_s28, %s2568_s10 }
  0x31   : > { %p2119_p12 = pnand %p2589_p11, %p2117_p10  ;;  %p2124_p6 = por %p2123_p4, %p2122_p2 }
  0x33   : > { %p2120_p13 = pneg %p2119_p12  ;;  %p2126_p3 = por %p2125_p5, %p2124_p6 }
  0x35   : > { %p2127_p0 = pnand %p2126_p3, %p2120_p13 }
  0x37   : > { %2130 = shalt.err (!%p2127_p0)
}
  0x38   : > { %s2131_s18 = scalar_lea.vmem %s2571_s17, 16  ;;  %s2398_s20 = smov [#allocation6]  }
  0x39   : > { %p2132_p10 = scmp.ne.s32.totalorder %s2571_s17, %s2131_s18  ;;  %s2136_s14 = sshll.u32 %s2398_s20, 4  ;;  %s2137_s14 = int_to_ptr.vmem [resolvable:$false] %s2136_s14 }
  0x3a   : > { %s2138_s4 = scalar_lea.vmem %s2137_s14, 32  ;;  %p2139_p9 = scmp.lt.s32.totalorder %s2571_s17, %s2137_s14 }
  0x3b   : > { %p2134_p12 = pnand %p2132_p10, %p2589_p11  ;;  %p2140_p1 = scmp.lt.s32.totalorder %s2138_s4, %s2131_s18 }
  0x3d   : > { %p2135_p8 = pneg %p2134_p12  ;;  %p2141_p2 = por %p2140_p1, %p2139_p9 }
  0x3f   : > { %p2142_p4 = pnand %p2141_p2, %p2135_p8 }
  0x41   : > { %2145 = shalt.err (!%p2142_p4)
}
  0x42   : > { %1970 = dma.hbm_to_vmem [thread:$0]  (!%p2575_p7), %s2568_s10, 16, %s2571_s17, %s2583_s11  }
  0x43   : > { %p3129_p0 = scmp.lt.s32.totalorder %s2396_s13, 5  ;;  %p3130_p3 = scmp.ge.s32.totalorder %s2396_s13, 1 }
  0x44   : > { %s3132_s7 = sld [smem:[#allocation37_spill]]  ;;  %s485_s20 = scalar_lea.vmem [#allocation9], %s2556_s19 }
  0x45   : > { %p2617_p5 = pnand %p3130_p3, %p3129_p0  ;;  %s492_s14 = sshll.u32 %s485_s20, 4  ;;  %s493_s14 = int_to_ptr.vmem [resolvable:$true] %s492_s14 }
  0x46   : > { %s3133_s4 = sand.u32 1, %s2396_s13  }
  0x47   : > { %s3131_s8 = scalar_select %p2617_p5, 1, 0 }
  0x48   : > { %s2630_s10 = scalar_lea.sflag [#allocation10], %s3133_s4 }
  0x4a   : > { %s2625_s28 = scalar_lea.hbm %s3132_s7, %s2562_s12  ;;  %s2151_s23 = scalar_lea.hbm %s3132_s7, 32 }
  0x4b   : > { %s2146_s17 = scalar_lea.hbm %s2625_s28, 16  ;;  %p2152_p13 = scmp.lt.u32.totalorder %s2625_s28, %s3132_s7 }
  0x4c   : > { %p2147_p1 = scmp.ne.s32.totalorder %s2625_s28, %s2146_s17  ;;  %p2153_p6 = scmp.lt.u32.totalorder %s2151_s23, %s2146_s17 }
  0x4d   : > { %p2155_p12 = scmp.lt.u32.totalorder %s2146_s17, %s2625_s28 }
  0x4e   : > { %p2149_p8 = pnand %p2147_p1, %p2589_p11  ;;  %p2154_p10 = por %p2153_p6, %p2152_p13 }
  0x50   : > { %p2150_p9 = pneg %p2149_p8  ;;  %p2156_p2 = por %p2155_p12, %p2154_p10 }
  0x52   : > { %p2157_p4 = pnand %p2156_p2, %p2150_p9 }
  0x54   : > { %2160 = shalt.err (!%p2157_p4)
}
  0x55   : > { %s2161_s20 = scalar_lea.vmem %s493_s14, 16  ;;  %s2399_s4 = smov [#allocation9]  }
  0x56   : > { %p2162_p0 = scmp.ne.s32.totalorder %s493_s14, %s2161_s20  ;;  %s2166_s1 = sshll.u32 %s2399_s4, 4  ;;  %s2167_s1 = int_to_ptr.vmem [resolvable:$false] %s2166_s1 }
  0x57   : > { %s2168_s3 = scalar_lea.vmem %s2167_s1, 32  ;;  %p2169_p8 = scmp.lt.s32.totalorder %s493_s14, %s2167_s1 }
  0x58   : > { %p2164_p3 = pnand %p2162_p0, %p2589_p11  ;;  %p2170_p5 = scmp.lt.s32.totalorder %s2168_s3, %s2161_s20 }
  0x5a   : > { %p2165_p1 = pneg %p2164_p3  ;;  %p2171_p7 = por %p2170_p5, %p2169_p8 }
  0x5c   : > { %p2172_p6 = pnand %p2171_p7, %p2165_p1 }
  0x5e   : > { %2175 = shalt.err (!%p2172_p6)
}
  0x5f   : > { %p3134_p13 = scmp.ne.s32.totalorder %s3127_s16, 0  ;;  %s2651_s1 = sadd.s32 4294967295, %s2396_s13  }
  0x60   : > { %s1774_s2 = sadd.s32 4294967294, %s2396_s13   ;;  %s46_s5 = sadd.s32 1, %s2392_s30 }
  0x61   : > { %1976 = dma.hbm_to_vmem [thread:$0]  (!%p3134_p13), %s2625_s28, 16, %s493_s14, %s2630_s10  }
  0x62   : > { %p3135_p7 = scmp.ne.s32.totalorder %s3123_s15, 0  ;;  %s53_s17 = sadd.s32 1, %s2376_s26 }
  0x63   : > { %p60_p5 = scmp.ne.s32.totalorder %s2376_s26, %s2372_s25  ;;  %p66_p10 = scmp.ne.s32.totalorder %s2372_s25, %s2368_s24 }
  0x64   : > { %s3194_s5 = smov (!%p3135_p7, %s46_s5), %s2392_s30  ;;  %p3136_p12 = scmp.eq.s32.totalorder %s2396_s13, 0 }
  0x65   : > { %p48_p9 = scmp.ge.s32.totalorder %s3194_s5, 2  ;;  %p67_p4 = scmp.eq.s32.totalorder %s2651_s1, 0 }
  0x66   : > { %p2665_p2 = por %p3136_p12, %p60_p5  ;;  %p3140_p3 = scmp.ne.s32.totalorder %s2360_s22, %s2356_s21 }
  0x67   : > { %s3196_s5 = smov (%p48_p9, %s3194_s5), 0  ;;  %p2675_p0 = por %p67_p4, %p66_p10 }
  0x68   : > { %3138 = sst [smem:[#allocation26_spill]] %s3196_s5  ;;  %p2682_p1 = por %p3140_p3, %p67_p4 }
  0x69   : > { %s3139_s15 = scalar_select %p2675_p0, 1, 0 }
  0x6a   : > { %s3141_s14 = scalar_select %p2682_p1, 1, 0 }
  0x6b   : > { %s50_s23 = ssub.s32 %s2392_s30, %s3196_s5  ;;  %p376_p8 = scmp.eq.s32.totalorder %s2651_s1, 3 }
  0x6c   : > { %3142 = sst [smem:[#allocation27_spill]] %s3141_s14  ;;  %p51_p6 = scmp.eq.s32.totalorder %s50_s23, 0 }
  0x6d   : > { %p382_p7 = scmp.eq.s32.totalorder %s1774_s2, 3  ;;  %p2689_p9 = por %p376_p8, %p60_p5 }
  0x6e   : > { %s402_s20 = sand.u32 1, %s2376_s26   ;;  %s1778_s7 = sshll.u32 %s2392_s30, 7 }
  0x6f   : > { %s3143_s18 = scalar_select %p2689_p9, 1, 0 }
  0x70   : > { %s2695_s4 = scalar_select %p51_p6, %s2376_s26, %s53_s17  }
  0x71   : > { %p2700_p12 = por %p382_p7, %p66_p10  ;;  %s1777_s21 = sshll.u32 %s402_s20, 3 }
  0x72   : > { %3144 = sst [smem:[#allocation28_spill]] %s2695_s4  ;;  %s3147_s0 = sld [smem:[#allocation30_spill]] }
  0x73   : > { %s3145_s3 = scalar_select %p2700_p12, 1, 0 }
  0x74   : > { %s406_s2 = scalar_lea.vmem [#allocation3], %s1777_s21  ;;  %p3148_p5 = scmp.lt.s32.totalorder %s2396_s13, 4 }
  0x75   : > { %3146 = sst [smem:[#allocation29_spill]] %s3145_s3  ;;  %s413_s23 = sshll.u32 %s406_s2, 4  ;;  %s2718_s23 = int_to_ptr.vmem [resolvable:$true] %s413_s23 }
  0x76   : > { %p2714_p4 = pnand %p3148_p5, %p2665_p2  ;;  %s3150_s6 = sld [smem:[#allocation36_spill]] }
  0x77   : > { %s403_s14 = scalar_lea.sflag [#allocation4], %s402_s20 }
  0x78   : > { %s2708_s5 = scalar_lea.hbm %s3147_s0, %s1778_s7  ;;  %p2178_p3 = pneg %p2714_p4 }
  0x79   : > { %s2176_s4 = scalar_lea.hbm %s2708_s5, 128  ;;  %s2181_s2 = scalar_lea.hbm %s3147_s0, 256 }
  0x7a   : > { %p2177_p10 = scmp.ne.s32.totalorder %s2708_s5, %s2176_s4  ;;  %p2182_p6 = scmp.lt.u32.totalorder %s2708_s5, %s3147_s0 }
  0x7b   : > { %p2183_p7 = scmp.lt.u32.totalorder %s2181_s2, %s2176_s4  ;;  %p2185_p12 = scmp.lt.u32.totalorder %s2176_s4, %s2708_s5 }
  0x7c   : > { %s2724_s7 = scalar_lea.hbm %s3150_s6, %s2562_s12  ;;  %p2179_p2 = pnand %p2178_p3, %p2177_p10 }
  0x7d   : > { %p2184_p5 = por %p2183_p7, %p2182_p6 }
  0x7e   : > { %p2180_p8 = pneg %p2179_p2 }
  0x7f   : > { %p2186_p9 = por %p2185_p12, %p2184_p5 }
  0x81   : > { %p2187_p1 = pnand %p2186_p9, %p2180_p8 }
  0x83   : > { %2190 = shalt.err (!%p2187_p1)
}
  0x84   : > { %s2191_s30 = scalar_lea.vmem %s2718_s23, 128  ;;  %s2400_s20 = smov [#allocation3]  }
  0x85   : > { %p2192_p10 = scmp.ne.s32.totalorder %s2718_s23, %s2191_s30  ;;  %s2196_s27 = sshll.u32 %s2400_s20, 4  ;;  %s2197_s27 = int_to_ptr.vmem [resolvable:$false] %s2196_s27 }
  0x86   : > { %s2198_s26 = scalar_lea.vmem %s2197_s27, 256  ;;  %p2199_p13 = scmp.lt.s32.totalorder %s2718_s23, %s2197_s27 }
  0x87   : > { %p2194_p2 = pnand %p2192_p10, %p2178_p3  ;;  %p2200_p6 = scmp.lt.s32.totalorder %s2198_s26, %s2191_s30 }
  0x89   : > { %p2195_p0 = pneg %p2194_p2  ;;  %p2201_p7 = por %p2200_p6, %p2199_p13 }
  0x8b   : > { %p2202_p12 = pnand %p2201_p7, %p2195_p0 }
  0x8d   : > { %2205 = shalt.err (!%p2202_p12)
}
  0x8e   : > { %1967 = dma.hbm_to_vmem [thread:$0]  (!%p2714_p4), %s2708_s5, 128, %s2718_s23, %s403_s14  }
  0x8f   : > { %s468_s4 = scalar_lea.vmem [#allocation8], %s2556_s19  ;;  %s3151_s9 = sld [smem:[#allocation39_spill]] }
  0x90   : > { %s475_s3 = sshll.u32 %s468_s4, 4  ;;  %s2206_s30 = scalar_lea.hbm %s2724_s7, 16  ;;  %s476_s3 = int_to_ptr.vmem [resolvable:$true] %s475_s3 }
  0x91   : > { %p2207_p13 = scmp.ne.s32.totalorder %s2724_s7, %s2206_s30  ;;  %s2211_s27 = scalar_lea.hbm %s3150_s6, 32 }
  0x92   : > { %p2212_p9 = scmp.lt.u32.totalorder %s2724_s7, %s3150_s6  ;;  %p2213_p4 = scmp.lt.u32.totalorder %s2211_s27, %s2206_s30 }
  0x93   : > { %p2209_p0 = pnand %p2207_p13, %p2589_p11  ;;  %p2215_p8 = scmp.lt.u32.totalorder %s2206_s30, %s2724_s7 }
  0x94   : > { %p2214_p3 = por %p2213_p4, %p2212_p9 }
  0x95   : > { %s2756_s2 = scalar_lea.hbm %s3151_s9, %s2562_s12  ;;  %p2210_p1 = pneg %p2209_p0 }
  0x96   : > { %p2216_p5 = por %p2215_p8, %p2214_p3 }
  0x98   : > { %p2217_p10 = pnand %p2216_p5, %p2210_p1 }
  0x9a   : > { %2220 = shalt.err (!%p2217_p10)
}
  0x9b   : > { %s2221_s12 = scalar_lea.vmem %s476_s3, 16  ;;  %s2401_s5 = smov [#allocation8]  }
  0x9c   : > { %p2222_p2 = scmp.ne.s32.totalorder %s476_s3, %s2221_s12  ;;  %s2226_s23 = sshll.u32 %s2401_s5, 4  ;;  %s2227_s23 = int_to_ptr.vmem [resolvable:$false] %s2226_s23 }
  0x9d   : > { %s2228_s14 = scalar_lea.vmem %s2227_s23, 32  ;;  %p2229_p12 = scmp.lt.s32.totalorder %s476_s3, %s2227_s23 }
  0x9e   : > { %p2224_p6 = pnand %p2222_p2, %p2589_p11  ;;  %p2230_p13 = scmp.lt.s32.totalorder %s2228_s14, %s2221_s12 }
  0xa0   : > { %p2225_p7 = pneg %p2224_p6  ;;  %p2231_p0 = por %p2230_p13, %p2229_p12 }
  0xa2   : > { %p2232_p4 = pnand %p2231_p0, %p2225_p7 }
  0xa4   : > { %2235 = shalt.err (!%p2232_p4)
}
  0xa5   : > { %p3152_p9 = scmp.ne.s32.totalorder %s3127_s16, 0  ;;  %s510_s0 = scalar_lea.vmem [#allocation11], %s2556_s19 }
  0xa6   : > { %s517_s4 = sshll.u32 %s510_s0, 4  ;;  %s2236_s28 = scalar_lea.hbm %s2756_s2, 16  ;;  %s518_s4 = int_to_ptr.vmem [resolvable:$true] %s517_s4 }
  0xa7   : > { %1973 = dma.hbm_to_vmem [thread:$0]  (!%p3152_p9), %s2724_s7, 16, %s476_s3, %s2583_s11  }
  0xa8   : > { %p2237_p1 = scmp.ne.s32.totalorder %s2756_s2, %s2236_s28  ;;  %s2241_s17 = scalar_lea.hbm %s3151_s9, 32 }
  0xa9   : > { %p2242_p5 = scmp.lt.u32.totalorder %s2756_s2, %s3151_s9  ;;  %p2243_p10 = scmp.lt.u32.totalorder %s2241_s17, %s2236_s28 }
  0xaa   : > { %p2239_p3 = pnand %p2237_p1, %p2589_p11  ;;  %p2245_p6 = scmp.lt.u32.totalorder %s2236_s28, %s2756_s2 }
  0xab   : > { %p2244_p2 = por %p2243_p10, %p2242_p5 }
  0xac   : > { %p2240_p8 = pneg %p2239_p3 }
  0xad   : > { %p2246_p7 = por %p2245_p6, %p2244_p2 }
  0xaf   : > { %p2247_p12 = pnand %p2246_p7, %p2240_p8 }
  0xb1   : > { %2250 = shalt.err (!%p2247_p12)
}
  0xb2   : > { %s2251_s19 = scalar_lea.vmem %s518_s4, 16  ;;  %s2402_s11 = smov [#allocation11]  }
  0xb3   : > { %p2252_p13 = scmp.ne.s32.totalorder %s518_s4, %s2251_s19  ;;  %s2256_s7 = sshll.u32 %s2402_s11, 4  ;;  %s2257_s7 = int_to_ptr.vmem [resolvable:$false] %s2256_s7 }
  0xb4   : > { %s2258_s3 = scalar_lea.vmem %s2257_s7, 32  ;;  %p2259_p1 = scmp.lt.s32.totalorder %s518_s4, %s2257_s7 }
  0xb5   : > { %p2254_p0 = pnand %p2252_p13, %p2589_p11  ;;  %p2260_p3 = scmp.lt.s32.totalorder %s2258_s3, %s2251_s19 }
  0xb7   : > { %p2255_p4 = pneg %p2254_p0  ;;  %p2261_p9 = por %p2260_p3, %p2259_p1 }
  0xb9   : > { %p2262_p5 = pnand %p2261_p9, %p2255_p4 }
  0xbb   : > { %2265 = shalt.err (!%p2262_p5)
}
  0xbc   : > { %p3153_p10 = scmp.ne.s32.totalorder %s3127_s16, 0  ;;  %p3154_p8 = scmp.ne.s32.totalorder %s3131_s8, 0 }
  0xbd   : > { %s2798_s29 = sand.u32 (!%p3154_p8), 1, %s2372_s25   ;;  %p3155_p11 = scmp.ne.s32.totalorder (!%p3154_p8), %s3139_s15, 0 }
  0xbe   : > { %1979 = dma.hbm_to_vmem [thread:$0]  (!%p3153_p10), %s2756_s2, 16, %s518_s4, %s2630_s10  }
  0xbf   : > { %540 = sbr.rel (%p3154_p8) target bundleno = 2867 (0xb33), region = 68  ;;  %s1784_s26 = sshll.u32 (!%p3154_p8), %s2798_s29, 3 }
  0xc0   : > { %s543_s12 = scalar_lea.sflag (!%p3154_p8), [#allocation4], %s2798_s29  ;;  %s546_s5 = scalar_lea.vmem (!%p3154_p8), [#allocation3], %s1784_s26 }
  0xc6   : > { %2339 = dma.done.wait (%p3155_p11), %s543_s12, 128  }
  0xc7   : > { %2341 = vsyncadd (%p3155_p11), %s543_s12, 4294967168  ;;  %s3156_s16 = sld [smem:[#allocation27_spill]]  ;;  %s551_s10 = sand.u32 1, %s2651_s1  }
  0xc8   : > { %s2808_s8 = sand.u32 1, %s2360_s22   ;;  %s552_s2 = scalar_lea.sflag [#allocation7], %s551_s10 }
  0xcd   : > { %p3157_p9 = scmp.ne.s32.totalorder %s3156_s16, 0 }
  0xcf   : > { %2343 = dma.done.wait (%p3157_p9), %s552_s2, 32  }
  0xd0   : > { %2345 = vsyncadd (%p3157_p9), %s552_s2, 4294967264  ;;  %s568_s15 = scalar_lea.sflag [#allocation10], %s551_s10 }
  0xd1   : > { %2347 = dma.done.wait (%p3157_p9), %s568_s15, 32  }
  0xd2   : > { %2349 = vsyncadd (%p3157_p9), %s568_s15, 4294967264  ;;  %s3158_s1 = sld [smem:[#allocation20_spill]]  ;;  %s3161_s10 = sld [smem:[#allocation33_spill]] }
  0xd3   : > { %s3162_s14 = sld [smem:[#allocation34_spill]]  ;;  %s3163_s6 = sld [smem:[#allocation38_spill]] }
  0xd4   : > { %s3164_s20 = sld [smem:[#allocation40_spill]]  ;;  %s3165_s25 = sld [smem:[#allocation41_spill]] }
  0xd5   : > { %s578_s16 = scalar_lea.vmem [#allocation11], %s2808_s8 }
  0xd8   : > { %p664_p2 = scmp.lt.s32.totalorder %s3158_s1, 1  ;;  %p1794_p6 = scmp.ne.s32.totalorder %s3158_s1, 0 }
  0xd9   : > { %v699_v0 = vld [vmem:[%s546_s5] sm:$0xff] (!%p1794_p6)  ;;  %vm700_vm0 = vcmask (!%p1794_p6), 261120  }
  0xda   : > { %s2823_s4 = scalar_select %p664_p2, %s3158_s1, 1 }
  0xdb   : > { %698 = sbr.rel (%p1794_p6) target bundleno = 226 (0xe2), region = 92 }
  0xdc   : > { %s1831_s7 = sshll.u32 %s2823_s4, 4  ;;  %s1834_s3 = sshll.u32 %s2823_s4, 5 }
  0xdd   : > { %s674_s2 = scalar_lea.vmem %s3161_s10, %s1831_s7  ;;  %s2841_s23 = scalar_lea.vmem %s3162_s14, %s1831_s7 }
  0xde   : > { %s2846_s9 = scalar_lea.vmem %s3163_s6, %s1831_s7  ;;  %s2851_s27 = scalar_lea.vmem %s3164_s20, %s1834_s3 }
  0xdf   : > { %s692_s12 = scalar_lea.vmem %s3165_s25, %s2823_s4  ;;  %s2858_s10 = scalar_lea.vmem [#allocation12], %s1784_s26 }
  0xe0   : > { %701 = vst.msk [vmem:[%s2858_s10] sm:$0xff] (!%p1794_p6), %vm700_vm0, %v699_v0 }
  0xe2 PF: > { %vm705_vm1 = vcmask 261120   ;;  %v2084_v8 = vld [vmem:[%s674_s2] sm:$0xff]   ;;  %v2403_v9 = vmov 0.0   ;;  %vm2404_vm2 = vmmov 0   ;;  %v2085_v10 = vld [vmem:[%s674_s2 + $0x8] sm:$0xff]   ;;  %s3166_s26 = sld [smem:[#allocation31_spill]] }
  0xe3   : > { %1868 = vmatprep.subr.bf16.mxu0 %v2403_v9  ;;  %1872 = vmatprep.mubr.msk.bf16.mxu0 %vm2404_vm2, %v2403_v9  ;;  %s3168_s1 = sld [smem:[#allocation32_spill]]  ;;  %s2405_s11 = smov 104   ;;  %vm811_vm3 = vcmask 64512   ;;  %vm1055_vm4 = vcmask 1043456   ;;  %vm1247_vm5 = vcmask 60416   ;;  %vm1255_vm6 = vcmask 126016  }
  0xe4   : > { %1869 = vmatpush3.bf16.msra.mxu0 %v2084_v8  ;;  %1876 = vmatprep.subr.bf16.mxu1 %v2403_v9  ;;  %s2406_s7 = smov 120   ;;  %s2407_s3 = smov 112   ;;  %vm1263_vm7 = vcmask 191616   ;;  %vm1271_vm8 = vcmask 257216   ;;  %vm1483_vm9 = vcmask 523264  }
  0xe5   : > { %1870 = vmatprep.subr.bf16.mxu0 %v2403_v9  ;;  %1878 = vmatprep.mubr.msk.bf16.mxu1 %vm2404_vm2, %v2403_v9  ;;  %s2408_s2 = smov 96   ;;  %s2409_s15 = smov 64  }
  0xe6   : > { %s2410_s28 = smov 8   ;;  %s2411_s21 = smov 16  }
  0xe7   : > { %v2863_v1 = vld [vmem:[%s2858_s10] sm:$0xff]  ;;  %s3170_s30 = scalar_lea.vmem [#allocation6], %s2808_s8  ;;  %s3171_s20 = scalar_lea.vmem [#allocation8], %s2808_s8 }
  0xe8   : > { %v706_v2 = vsel %vm705_vm1, %v2863_v1, 0.0  ;;  %1871 = vmatpush3.bf16.msra.mxu0 %v2085_v10  ;;  %s3167_s5 = scalar_lea.vmem %s3166_s26, %s2823_s4  ;;  %s3172_s19 = scalar_lea.vmem [#allocation9], %s2808_s8 }
  0xe9   : > { %707 = vadd.xlane.f32.xlu0 %v706_v2  ;;  %1882 = vmatprep.subr.bf16.mxu0 %v2403_v9  ;;  %v1795_v15 = vld [vmem:[%s3167_s5] ss:$0 sm:$0xff]  ;;  %s3169_s17 = scalar_lea.vmem %s3168_s1, %s2823_s4  ;;  %s1543_s25 = sshll.u32 %s2858_s10, 4  ;;  %s3006_s25 = int_to_ptr.vmem [resolvable:$true] %s1543_s25 }
  0xea   : > { %v1796_v17 = vld [vmem:[%s3169_s17] ss:$0 sm:$0xff]  ;;  %s3175_s14 = sld [smem:[#allocation42_spill]]  ;;  %s1530_s4 = scalar_lea.sflag [#allocation5], %s2798_s29 }
  0xeb   : > { %p3176_p12 = scmp.ne.s32.totalorder %s3143_s18, 0  ;;  %s2413_s1 = smov [#allocation12]  }
  0xec   : > { %s2270_s17 = sshll.u32 %s2413_s1, 4  ;;  %s2271_s17 = int_to_ptr.vmem [resolvable:$false] %s2270_s17 }
  0xed   : > { %p2273_p4 = scmp.lt.s32.totalorder %s3006_s25, %s2271_s17 }
 0x176   : > { %v708_v3 = vpop.xlane.xlu0 %707 }
 0x177   : > { %v710_v4 = vmul.f32 0.03125, %v708_v3 }
 0x179   : > { %v711_v5 = vsub.f32 %v2863_v1, %v710_v4 }
 0x17b   : > { %v712_v6 = vmul.f32 %v711_v5, %v711_v5 }
 0x17d   : > { %v713_v7 = vsel %vm705_vm1, %v712_v6, 0.0 }
 0x17e   : > { %714 = vadd.xlane.f32.xlu0 %v713_v7 }
 0x20b   : > { %v715_v11 = vpop.xlane.xlu0 %714 }
 0x20c   : > { %v716_v12 = vmul.f32 0.03125, %v715_v11 }
 0x20e   : > { %v717_v13 = vadd.f32 1e-05, %v716_v12 }
 0x210   : > { %2094 = vrsqrt.f32 %v717_v13 }
 0x21a   : > { %v2095_v14 = vpop.eup %2094 }
 0x21b   : > { %v719_v16 = vmul.f32 %v2095_v14, %v711_v5 }
 0x21d   : > { %v726_v18 = vmul.f32 %v1795_v15, %v719_v16 }
 0x21f   : > { %v733_v19 = vadd.f32 %v1796_v17, %v726_v18 }
 0x221   : > { %v734_v20 = vpack.c.bf16 %v733_v19, %v733_v19 }
 0x223   : > { %1873 = vmatmul.mubr.msk.bf16.vlgmr.msra.gmra.mrb[0].mxu0 %vm705_vm1, %v734_v20 }
 0x224   : > { %1884 = vmatprep.mubr.msk.bf16.mxu0 %vm2404_vm2, %v2403_v9 }
 0x2f6   : > { %v788_v21 = vpop.f32.mrb[0].mxu0 }
 0x2f7   : > { %v2890_v22 = vpack.c.bf16 %v788_v21, %v788_v21  ;;  %v1874_v23 = vpop.f32.mrb[1].mxu0 }
 0x2f8   : > { %v791_v24 = vpop.f32.mrb[2].mxu0 }
 0x2f9   : > { %802 = vrot.lane.b32.xlu0 %v2890_v22, %s2405_s11  ;;  %796 = vrot.lane.b32.xlu1 %v2890_v22, %s2406_s7  ;;  %v1875_v25 = vpop.f32.mrb[3].mxu0  ;;  %v805_v31 = vmul.bf16 1052065461, %v2890_v22  ;;  %s2272_s11 = scalar_lea.vmem %s2271_s17, 256 }
 0x2fd   : > { %799 = vrot.lane.b32.xlu1 %v2890_v22, %s2407_s3 }
 0x301   : > { %809 = vrot.lane.b32.xlu1 %v2890_v22, %s2408_s2 }
 0x36b   : > { %v2896_v26 = vpop.permute.xlu1 %796  ;;  %v2902_v28 = vpop.permute.xlu0 %802 }
 0x36c   : > { %858 = vrot.lane.b32.xlu1 %v2896_v26, %s2408_s2  ;;  %v806_v36 = vmul.bf16 1052065461, %v2896_v26  ;;  %v808_v40 = vmul.bf16 1052065461, %v2902_v28 }
 0x36f   : > { %v2899_v27 = vpop.permute.xlu1 %799 }
 0x370   : > { %906 = vrot.lane.b32.xlu1 %v2899_v27, %s2408_s2  ;;  %v807_v39 = vmul.bf16 1052065461, %v2899_v27 }
 0x373   : > { %v810_v29 = vpop.permute.xlu1 %809 }
 0x374   : > { %954 = vrot.lane.b32.xlu1 %v2902_v28, %s2408_s2  ;;  %v816_v30 = vsel %vm811_vm3, %v810_v29, 0 }
 0x375   : > { %1877 = vmatpush3.bf16.xpose.msra.mxu1 %v816_v30 }
 0x376   : > { %1888 = vmatprep.subr.bf16.mxu1 %v2403_v9 }
 0x37c   : > { %1879 = vmatmul.mubr.msk.bf16.vlgmr.msra.gmra.mrb[0].mxu1 %vm811_vm3, %v805_v31 }
 0x37d   : > { %1890 = vmatprep.mubr.msk.bf16.mxu1 %vm2404_vm2, %v2403_v9 }
 0x3de   : > { %v859_v32 = vpop.permute.xlu1 %858 }
 0x3df   : > { %v864_v33 = vsel %vm811_vm3, %v859_v32, 0 }
 0x3e0   : > { %1883 = vmatpush3.bf16.xpose.msra.mxu0 %v864_v33 }
 0x3e1   : > { %1894 = vmatprep.subr.bf16.mxu0 %v2403_v9 }
 0x3e2   : > { %v907_v34 = vpop.permute.xlu1 %906 }
 0x3e3   : > { %v912_v35 = vsel %vm811_vm3, %v907_v34, 0 }
 0x3e4   : > { %1889 = vmatpush3.bf16.xpose.msra.mxu1 %v912_v35 }
 0x3e5   : > { %1900 = vmatprep.subr.bf16.mxu1 %v2403_v9 }
 0x3e6   : > { %v955_v37 = vpop.permute.xlu1 %954 }
 0x3e7   : > { %v960_v38 = vsel %vm811_vm3, %v955_v37, 0  ;;  %1885 = vmatmul.mubr.msk.bf16.vlgmr.msra.gmra.mrb[4].mxu0 %vm811_vm3, %v806_v36 }
 0x3e8   : > { %1895 = vmatpush3.bf16.xpose.msra.mxu0 %v960_v38  ;;  %1896 = vmatprep.mubr.msk.bf16.mxu0 %vm2404_vm2, %v2403_v9 }
 0x3e9   : > { %1906 = vmatprep.subr.bf16.mxu0 %v2403_v9 }
 0x3eb   : > { %1891 = vmatmul.mubr.msk.bf16.vlgmr.msra.gmra.mrb[4].mxu1 %vm811_vm3, %v807_v39 }
 0x3ec   : > { %1902 = vmatprep.mubr.msk.bf16.mxu1 %vm2404_vm2, %v2403_v9 }
 0x3ef   : > { %1897 = vmatmul.mubr.msk.bf16.vlgmr.msra.gmra.mrb[8].mxu0 %vm811_vm3, %v808_v40 }
 0x3f0   : > { %1908 = vmatprep.mubr.msk.bf16.mxu0 %vm2404_vm2, %v2403_v9 }
 0x44f   : > { %v852_v41 = vpop.f32.mrb[0].mxu1 }
 0x450   : > { %v1880_v42 = vpop.f32.mrb[1].mxu1  ;;  %v1002_v43 = vsel %vm811_vm3, %v852_v41, -inf }
 0x451   : > { %1003 = vmax.xlane.f32.xlu1 %v1002_v43  ;;  %v855_v44 = vpop.f32.mrb[2].mxu1 }
 0x452   : > { %v1881_v45 = vpop.f32.mrb[3].mxu1 }
 0x4ba   : > { %v900_v46 = vpop.f32.mrb[4].mxu0 }
 0x4bb   : > { %v1886_v47 = vpop.f32.mrb[5].mxu0  ;;  %v1005_v48 = vsel %vm811_vm3, %v900_v46, -inf }
 0x4bc   : > { %1006 = vmax.xlane.f32.xlu0 %v1005_v48  ;;  %v903_v49 = vpop.f32.mrb[6].mxu0  ;;  %v2086_v48 = vld [vmem:[%s2841_s23] sm:$0xff]  }
 0x4bd   : > { %v1887_v50 = vpop.f32.mrb[7].mxu0  ;;  %v2087_v49 = vld [vmem:[%s2841_s23 + $0x8] sm:$0xff]   ;;  %s2412_s23 = smov 24  }
 0x4be   : > { %v948_v51 = vpop.f32.mrb[4].mxu1 }
 0x4bf   : > { %v1892_v52 = vpop.f32.mrb[5].mxu1  ;;  %v1008_v53 = vsel %vm811_vm3, %v948_v51, -inf }
 0x4c0   : > { %1009 = vmax.xlane.f32.xlu1 %v1008_v53  ;;  %v951_v54 = vpop.f32.mrb[6].mxu1 }
 0x4c1   : > { %v1893_v55 = vpop.f32.mrb[7].mxu1 }
 0x4c2   : > { %v996_v56 = vpop.f32.mrb[8].mxu0 }
 0x4c3   : > { %v1898_v57 = vpop.f32.mrb[9].mxu0  ;;  %v1011_v58 = vsel %vm811_vm3, %v996_v56, -inf }
 0x4c4   : > { %1012 = vmax.xlane.f32.xlu0 %v1011_v58  ;;  %v999_v59 = vpop.f32.mrb[10].mxu0 }
 0x4c5   : > { %v1899_v60 = vpop.f32.mrb[11].mxu0 }
 0x4d1   : > { %1050 = vrot.lane.b32.xlu1 %v2890_v22, %s2409_s15 }
 0x4de   : > { %v1004_v61 = vpop.xlane.xlu1 %1003 }
 0x4df   : > { %v1014_v62 = vsub.f32 %v852_v41, %v1004_v61 }
 0x4e1   : > { %v1018_v63 = vmul.f32 1.442695, %v1014_v62 }
 0x4e3   : > { %2096 = vpow2.f32 %v1018_v63 }
 0x4ed   : > { %v2097_v0 = vpop.eup %2096 }
 0x4ee   : > { %v1026_v2 = vsel %vm811_vm3, %v2097_v0, 0.0 }
 0x4f5   : > { %1027 = vadd.xlane.f32.xlu1 %v1026_v2 }
 0x549   : > { %v1007_v3 = vpop.xlane.xlu0 %1006 }
 0x54a   : > { %v1015_v4 = vsub.f32 %v900_v46, %v1007_v3 }
 0x54c   : > { %v1020_v5 = vmul.f32 1.442695, %v1015_v4 }
 0x54d   : > { %v1010_v6 = vpop.xlane.xlu1 %1009 }
 0x54e   : > { %2098 = vpow2.f32 %v1020_v5  ;;  %v1016_v7 = vsub.f32 %v948_v51, %v1010_v6 }
 0x550   : > { %v1022_v8 = vmul.f32 1.442695, %v1016_v7  ;;  %v1814_v7 = vld [vmem:[%s3170_s30] ss:$0 sm:$0xff] }
 0x551   : > { %v1051_v10 = vpop.permute.xlu1 %1050  ;;  %v1013_v11 = vpop.xlane.xlu0 %1012 }
 0x552   : > { %2100 = vpow2.f32 %v1022_v8  ;;  %v1057_v12 = vsel %vm1055_vm4, %v1051_v10, 0  ;;  %v1017_v13 = vsub.f32 %v996_v56, %v1013_v11 }
 0x553   : > { %1901 = vmatpush3.bf16.msra.mxu1 %v1057_v12 }
 0x554   : > { %v1024_v14 = vmul.f32 1.442695, %v1017_v13  ;;  %1912 = vmatprep.subr.bf16.mxu1 %v2403_v9 }
 0x556   : > { %2102 = vpow2.f32 %v1024_v14 }
 0x558   : > { %v2099_v15 = vpop.eup %2098 }
 0x559   : > { %v1029_v16 = vsel %vm811_vm3, %v2099_v15, 0.0 }
 0x55a   : > { %1030 = vadd.xlane.f32.xlu0 %v1029_v16 }
 0x55c   : > { %v2101_v17 = vpop.eup %2100 }
 0x55d   : > { %v1032_v18 = vsel %vm811_vm3, %v2101_v17, 0.0 }
 0x55e   : > { %1033 = vadd.xlane.f32.xlu1 %v1032_v18 }
 0x560   : > { %v2103_v19 = vpop.eup %2102 }
 0x561   : > { %v1035_v20 = vsel %vm811_vm3, %v2103_v19, 0.0 }
 0x562   : > { %1036 = vadd.xlane.f32.xlu0 %v1035_v20  ;;  %v2088_v20 = vld [vmem:[%s2846_s9] sm:$0xff]  }
 0x56f   : > { %1147 = vrot.lane.b32.xlu1 %v2899_v27, %s2409_s15 }
 0x573   : > { %1195 = vrot.lane.b32.xlu1 %v2902_v28, %s2409_s15 }
 0x578   : > { %1099 = vrot.lane.b32.xlu0 %v2896_v26, %s2409_s15 }
 0x582   : > { %v1028_v21 = vpop.xlane.xlu1 %1027 }
 0x583   : > { %2104 = vrcp.f32 %v1028_v21 }
 0x58d   : > { %v2105_v22 = vpop.eup %2104 }
 0x58e   : > { %v1042_v23 = vmul.f32 %v2105_v22, %v2097_v0 }
 0x590   : > { %v1046_v24 = vpack.c.bf16 %v1042_v23, %v1042_v23 }
 0x592   : > { %1903 = vmatmul.mubr.msk.bf16.vlgmr.msra.gmra.mrb[8].mxu1 %vm811_vm3, %v1046_v24 }
 0x593   : > { %1914 = vmatprep.mubr.msk.bf16.mxu1 %vm2404_vm2, %v2403_v9 }
 0x5e7   : > { %v1031_v25 = vpop.xlane.xlu0 %1030 }
 0x5e8   : > { %2106 = vrcp.f32 %v1031_v25  ;;  %v1815_v25 = vld [vmem:[%s3171_s20] ss:$0 sm:$0xff] }
 0x5eb   : > { %v1034_v29 = vpop.xlane.xlu1 %1033 }
 0x5ec   : > { %2108 = vrcp.f32 %v1034_v29 }
 0x5ef   : > { %v1148_v27 = vpop.permute.xlu1 %1147  ;;  %v1037_v30 = vpop.xlane.xlu0 %1036 }
 0x5f0   : > { %v1153_v28 = vsel %vm1055_vm4, %v1148_v27, 0  ;;  %2110 = vrcp.f32 %v1037_v30  ;;  %v1816_v27 = vld [vmem:[%s3172_s19] ss:$0 sm:$0xff] }
 0x5f1   : > { %1913 = vmatpush3.bf16.msra.mxu1 %v1153_v28 }
 0x5f2   : > { %v2107_v26 = vpop.eup %2106  ;;  %1924 = vmatprep.subr.bf16.mxu1 %v2403_v9 }
 0x5f3   : > { %v1043_v31 = vmul.f32 %v2107_v26, %v2099_v15  ;;  %v1100_v32 = vpop.permute.xlu0 %1099  ;;  %v1196_v34 = vpop.permute.xlu1 %1195 }
 0x5f4   : > { %v1105_v33 = vsel %vm1055_vm4, %v1100_v32, 0  ;;  %v1201_v38 = vsel %vm1055_vm4, %v1196_v34, 0  ;;  %v2091_v32 = vld [vmem:[%s2851_s27 + $0x8] sm:$0xff]   ;;  %v2093_v34 = vld [vmem:[%s2851_s27 + $0x18] sm:$0xff]  }
 0x5f5   : > { %1907 = vmatpush3.bf16.msra.mxu0 %v1105_v33  ;;  %v1047_v35 = vpack.c.bf16 %v1043_v31, %v1043_v31  ;;  %v2090_v31 = vld [vmem:[%s2851_s27] sm:$0xff]   ;;  %v2092_v33 = vld [vmem:[%s2851_s27 + $0x10] sm:$0xff]  }
 0x5f6   : > { %v2109_v36 = vpop.eup %2108  ;;  %1918 = vmatprep.subr.bf16.mxu0 %v2403_v9 }
 0x5f7   : > { %v1044_v37 = vmul.f32 %v2109_v36, %v2101_v17 }
 0x5f8   : > { %1909 = vmatmul.mubr.msk.bf16.vlgmr.msra.gmra.mrb[12].mxu0 %vm811_vm3, %v1047_v35  ;;  %v1817_v35 = vld [vmem:[%s578_s16] ss:$0 sm:$0xff] }
 0x5f9   : > { %1919 = vmatpush3.bf16.msra.mxu0 %v1201_v38  ;;  %v1048_v39 = vpack.c.bf16 %v1044_v37, %v1044_v37  ;;  %1920 = vmatprep.mubr.msk.bf16.mxu0 %vm2404_vm2, %v2403_v9 }
 0x5fa   : > { %v2111_v40 = vpop.eup %2110  ;;  %1932 = vmatprep.subr.bf16.mxu0 %v2403_v9 }
 0x5fb   : > { %v1045_v41 = vmul.f32 %v2111_v40, %v2103_v19  ;;  %1915 = vmatmul.mubr.msk.bf16.vlgmr.msra.gmra.mrb[12].mxu1 %vm811_vm3, %v1048_v39 }
 0x5fc   : > { %1928 = vmatprep.mubr.msk.bf16.mxu1 %vm2404_vm2, %v2403_v9  ;;  %1925 = vmatpush3.bf16.msra.mxu1 %v2086_v48 }
 0x5fd   : > { %v1049_v42 = vpack.c.bf16 %v1045_v41, %v1045_v41  ;;  %1926 = vmatprep.subr.bf16.mxu1 %v2403_v9 }
 0x600   : > { %1921 = vmatmul.mubr.msk.bf16.vlgmr.msra.gmra.mrb[16].mxu0 %vm811_vm3, %v1049_v42  ;;  %1927 = vmatpush3.bf16.msra.mxu1 %v2087_v49 }
 0x601   : > { %1936 = vmatprep.mubr.msk.bf16.mxu0 %vm2404_vm2, %v2403_v9  ;;  %1940 = vmatprep.subr.bf16.mxu1 %v2403_v9 }
 0x602   : > { %1933 = vmatpush3.bf16.msra.mxu0 %v2088_v20 }
 0x603   : > { %1934 = vmatprep.subr.bf16.mxu0 %v2403_v9 }
 0x665   : > { %v1093_v43 = vpop.f32.mrb[8].mxu1 }
 0x666   : > { %v1243_v44 = vpack.c.bf16 %v1093_v43, %v1093_v43  ;;  %v1904_v45 = vpop.f32.mrb[9].mxu1 }
 0x667   : > { %v1096_v46 = vpop.f32.mrb[10].mxu1 }
 0x668   : > { %1248 = vst.msk [vmem:[#allocation2] sm:$0xf] %vm1247_vm5, %v1243_v44  ;;  %v1905_v47 = vpop.f32.mrb[11].mxu1  ;;  %v1821_v46 = vld [vmem:[%s692_s12] ss:$0 sm:$0xff]  ;;  %s2266_s12 = scalar_lea.vmem %s3006_s25, 128 }
 0x669   : > { %p2267_p7 = scmp.ne.s32.totalorder %s3006_s25, %s2266_s12  ;;  %p2274_p1 = scmp.lt.s32.totalorder %s2272_s11, %s2266_s12 }
 0x66b   : > { %p2268_p13 = pnand %p2267_p7, %p3176_p12  ;;  %p2275_p3 = por %p2274_p1, %p2273_p4 }
 0x66d   : > { %p2269_p0 = pneg %p2268_p13 }
 0x66f   : > { %p2276_p5 = pnand %p2275_p3, %p2269_p0 }
 0x6cb   : > { %v1141_v50 = vpop.f32.mrb[12].mxu0 }
 0x6cc   : > { %v1835_v51 = vpack.c.bf16 %v1141_v50, %v1141_v50  ;;  %v1910_v52 = vpop.f32.mrb[13].mxu0 }
 0x6cd   : > { %v1144_v53 = vpop.f32.mrb[14].mxu0 }
 0x6ce   : > { %v1189_v54 = vpop.f32.mrb[12].mxu1  ;;  %1252 = vrot.lane.b32.xlu0 %v1835_v51, %s2410_s28  ;;  %v1911_v55 = vpop.f32.mrb[15].mxu0 }
 0x6cf   : > { %v1836_v56 = vpack.c.bf16 %v1189_v54, %v1189_v54  ;;  %v1916_v57 = vpop.f32.mrb[13].mxu1 }
 0x6d0   : > { %v1192_v58 = vpop.f32.mrb[14].mxu1 }
 0x6d1   : > { %1260 = vrot.lane.b32.xlu1 %v1836_v56, %s2411_s21  ;;  %v1917_v59 = vpop.f32.mrb[15].mxu1 }
 0x6d3   : > { %v1237_v60 = vpop.f32.mrb[16].mxu0 }
 0x6d4   : > { %v1837_v61 = vpack.c.bf16 %v1237_v60, %v1237_v60  ;;  %v1922_v62 = vpop.f32.mrb[17].mxu0 }
 0x6d5   : > { %v1240_v63 = vpop.f32.mrb[18].mxu0 }
 0x6d6   : > { %1268 = vrot.lane.b32.xlu0 %v1837_v61, %s2412_s23  ;;  %v1923_v0 = vpop.f32.mrb[19].mxu0 }
 0x740   : > { %v1253_v2 = vpop.permute.xlu0 %1252 }
 0x741   : > { %1256 = vst.msk [vmem:[#allocation2] sm:$0xf] %vm1255_vm6, %v1253_v2 }
 0x743   : > { %v1261_v3 = vpop.permute.xlu1 %1260 }
 0x744   : > { %1264 = vst.msk [vmem:[#allocation2] sm:$0xf] %vm1263_vm7, %v1261_v3 }
 0x748   : > { %v1269_v4 = vpop.permute.xlu0 %1268 }
 0x749   : > { %1272 = vst.msk [vmem:[#allocation2] sm:$0xf] %vm1271_vm8, %v1269_v4 }
 0x750   : > { %v1273_v5 = vld [vmem:[#allocation2] sm:$0xf] }
 0x751   : > { %1929 = vmatmul.mubr.msk.bf16.vlgmr.msra.gmra.mrb[16].mxu1 %vm705_vm1, %v1273_v5 }
 0x752   : > { %1948 = vmatprep.mubr.msk.bf16.mxu1 %vm2404_vm2, %v2403_v9  ;;  %1941 = vmatpush3.bf16.msra.mxu1 %v2090_v31 }
 0x753   : > { %1942 = vmatprep.subr.bf16.mxu1 %v2403_v9 }
 0x756   : > { %1943 = vmatpush3.bf16.msra.mxu1 %v2091_v32 }
 0x757   : > { %1944 = vmatprep.subr.bf16.mxu1 %v2403_v9 }
 0x75a   : > { %1945 = vmatpush3.bf16.msra.mxu1 %v2092_v33 }
 0x75b   : > { %1946 = vmatprep.subr.bf16.mxu1 %v2403_v9 }
 0x75e   : > { %1947 = vmatpush3.bf16.msra.mxu1 %v2093_v34 }
 0x824   : > { %v1327_v6 = vpop.f32.mrb[16].mxu1 }
 0x825   : > { %v1333_v8 = vadd.f32 %v1327_v6, %v2863_v1  ;;  %v1930_v10 = vpop.f32.mrb[17].mxu1  ;;  %v2089_v1 = vld [vmem:[%s2846_s9 + $0x8] sm:$0xff]   ;;  %s3173_s9 = sld [smem:[#allocation21_spill]] }
 0x826   : > { %v1330_v11 = vpop.f32.mrb[18].mxu1  ;;  %1935 = vmatpush3.bf16.msra.mxu0 %v2089_v1 }
 0x827   : > { %v1341_v12 = vadd.f32 %v1814_v7, %v1333_v8  ;;  %v1931_v13 = vpop.f32.mrb[19].mxu1 }
 0x829   : > { %v1344_v14 = vsel %vm705_vm1, %v1341_v12, 0.0 }
 0x82a   : > { %1345 = vadd.xlane.f32.xlu1 %v1344_v14 }
 0x82b   : > { %s1828_s6 = sshll.u32 %s3173_s9, 7 }
 0x82c   : > { %s3004_s0 = scalar_lea.hbm %s3175_s14, %s1828_s6 }
 0x8b7   : > { %v1346_v15 = vpop.xlane.xlu1 %1345 }
 0x8b8   : > { %v1347_v16 = vmul.f32 0.03125, %v1346_v15 }
 0x8ba   : > { %v1348_v17 = vsub.f32 %v1341_v12, %v1347_v16 }
 0x8bc   : > { %v1349_v18 = vmul.f32 %v1348_v17, %v1348_v17 }
 0x8be   : > { %v1350_v19 = vsel %vm705_vm1, %v1349_v18, 0.0 }
 0x8bf   : > { %1351 = vadd.xlane.f32.xlu0 %v1350_v19 }
 0x94c   : > { %v1352_v21 = vpop.xlane.xlu0 %1351 }
 0x94d   : > { %v1353_v22 = vmul.f32 0.03125, %v1352_v21 }
 0x94f   : > { %v1354_v23 = vadd.f32 1e-05, %v1353_v22 }
 0x951   : > { %2112 = vrsqrt.f32 %v1354_v23 }
 0x95b   : > { %v2113_v24 = vpop.eup %2112 }
 0x95c   : > { %v1356_v29 = vmul.f32 %v2113_v24, %v1348_v17 }
 0x95e   : > { %v1363_v30 = vmul.f32 %v1815_v25, %v1356_v29 }
 0x960   : > { %v1370_v28 = vadd.f32 %v1816_v27, %v1363_v30 }
 0x962   : > { %v1371_v26 = vpack.c.bf16 %v1370_v28, %v1370_v28 }
 0x964   : > { %1937 = vmatmul.mubr.msk.bf16.vlgmr.msra.gmra.mrb[20].mxu0 %vm705_vm1, %v1371_v26 }
 0xa37   : > { %v1432_v36 = vpop.f32.mrb[20].mxu0 }
 0xa38   : > { %v1433_v37 = vadd.f32 %v1817_v35, %v1432_v36  ;;  %v1938_v38 = vpop.f32.mrb[21].mxu0 }
 0xa39   : > { %v1435_v39 = vpop.f32.mrb[22].mxu0 }
 0xa3a   : > { %v1439_v40 = vmul.f32 0.70710677, %v1433_v37  ;;  %v1939_v41 = vpop.f32.mrb[23].mxu0  ;;  %v1438_v43 = vmul.f32 0.5, %v1433_v37 }
 0xa3c   : > { %2114 = verf.f32 %v1439_v40 }
 0xa46   : > { %v2115_v42 = vpop.eup %2114 }
 0xa47   : > { %v1441_v44 = vadd.f32 1.0, %v2115_v42 }
 0xa49   : > { %v1442_v45 = vmul.f32 %v1441_v44, %v1438_v43 }
 0xa4b   : > { %v1443_v9 = vpack.c.bf16 %v1442_v45, %v1442_v45 }
 0xa4d   : > { %1949 = vmatmul.mubr.msk.bf16.vlgmr.msra.gmra.mrb[20].mxu1 %vm1483_vm9, %v1443_v9 }
 0xb20   : > { %v1521_v47 = vpop.f32.mrb[20].mxu1 }
 0xb21   : > { %v1522_v48 = vadd.f32 %v1821_v46, %v1521_v47  ;;  %v1950_v49 = vpop.f32.mrb[21].mxu1 }
 0xb22   : > { %v1524_v50 = vpop.f32.mrb[22].mxu1 }
 0xb23   : > { %v1527_v51 = vadd.f32 %v1522_v48, %v1341_v12  ;;  %v1951_v52 = vpop.f32.mrb[23].mxu1 }
 0xb25   : > { %1528 = vst.msk [vmem:[%s2858_s10] sm:$0xff] %vm705_vm1, %v1527_v51 }
 0xb26   : > { %2279 = shalt.err (!%p2276_p5)
}
 0xb27   : > { %s2280_s29 = scalar_lea.hbm %s3004_s0, 128  ;;  %s2284_s3 = scalar_lea.hbm %s3175_s14, 256 }
 0xb28   : > { %p2281_p10 = scmp.ne.s32.totalorder %s3004_s0, %s2280_s29  ;;  %p2285_p9 = scmp.lt.u32.totalorder %s3004_s0, %s3175_s14 }
 0xb29   : > { %p2286_p2 = scmp.lt.u32.totalorder %s2284_s3, %s2280_s29  ;;  %p2288_p7 = scmp.lt.u32.totalorder %s2280_s29, %s3004_s0 }
 0xb2a   : > { %p2282_p8 = pnand %p2281_p10, %p3176_p12 }
 0xb2b   : > { %p2287_p6 = por %p2286_p2, %p2285_p9 }
 0xb2c   : > { %p2283_p11 = pneg %p2282_p8 }
 0xb2d   : > { %p2289_p13 = por %p2288_p7, %p2287_p6 }
 0xb2f   : > { %p2290_p0 = pnand %p2289_p13, %p2283_p11 }
 0xb31   : > { %2293 = shalt.err (!%p2290_p0)
}
 0xb32   : > { %1962 = dma.vmem_to_hbm [thread:$0]  (%p3176_p12), %s3006_s25, 128, %s3004_s0, %s1530_s4  }
 0xb33 PF: > { %s3177_s28 = sld [smem:[#allocation29_spill]]  ;;  %p1985_p4 = scmp.ge.s32.totalorder %s2396_s13, 2 }
 0xb34   : > { %s1555_s21 = sand.u32 1, %s2368_s24  }
 0xb35   : > { %s1556_s23 = scalar_lea.sflag [#allocation5], %s1555_s21 }
 0xb39   : > { %p3178_p1 = scmp.ne.s32.totalorder %s3177_s28, 0 }
 0xb3b   : > { %p1981_p3 = pnand %p1985_p4, %p3178_p1 }
 0xb3d   : > { %2351 = dma.done.wait (!%p1981_p3), %s1556_s23, 128  }
 0xb3e   : > { %2353 = vsyncadd (!%p1981_p3), %s1556_s23, 4294967168  ;;  %s34_s13 = sadd.s32 1, %s2396_s13   ;;  %s3179_s30 = sld [smem:[#allocation17_spill]] }
 0xb3f   : > { %p31_p5 = scmp.ge.s32.totalorder %s34_s13, 6   ;;  %s3180_s23 = sld [smem:[#allocation25_spill]] }
 0xb40   : > { %s3181_s24 = sld [smem:[#allocation18_spill]]  ;;  %s3182_s25 = sld [smem:[#allocation19_spill]] }
 0xb41   : > { %s3183_s26 = sld [smem:[#allocation28_spill]]  ;;  %s3184_s27 = sld [smem:[#allocation22_spill]] }
 0xb42   : > { %s3185_s28 = sld [smem:[#allocation23_spill]]  ;;  %s3186_s29 = sld [smem:[#allocation24_spill]] }
 0xb43   : > { %s3187_s18 = sld [smem:[#allocation26_spill]]  ;;  %s3188_s21 = smov %s2360_s22 }
 0xb44   : > { %s3189_s22 = smov %s3179_s30  ;;  %33 = sbr.rel (!%p31_p5) target bundleno = 27 (0x1b), region = 186 }
 0xb49   : > { %s3190_s30 = smov %s3187_s18 }
 0xb4b   :  { %1561 = vsyncpa [#allocation4], 1 }
 0xb4c   :  { %1563 = vsyncpa [#allocation4 + $0x1], 1 }
 0xb4d   :  { %1564 = vsyncpa [#allocation7], 1 }
 0xb4e   :  { %1566 = vsyncpa [#allocation7 + $0x1], 1 }
 0xb4f   :  { %1567 = vsyncpa [#allocation10], 1 }
 0xb50   :  { %1569 = vsyncpa [#allocation10 + $0x1], 1 }
 0xb51   :  { %1570 = vsyncpa [#allocation5], 1 }
 0xb52   :  { %1572 = vsyncpa [#allocation5 + $0x1], 1 }

</bundles_post_ra>
